<compile_context>
chip_gen: v7x
topology: tpu7x:2x2x1
jax: 0.10.0
libtpu: 0.0.40
codegen_flags: <defaults>
</compile_context>

<pallas_src>
import functools

import jax
import jax.numpy as jnp
from jax.experimental import pallas as pl
from jax.experimental.pallas import tpu as pltpu

NEGATIVE_SLOPE = 0.82
LANE = 128


def _round_up(x, m):
    return (x + m - 1) // m * m


def _tensorcores_per_chip():
    """Best effort: v5e / v6e have one TensorCore per chip, v7x (and v4/v5p) two."""
    try:
        kind = jax.devices()[0].device_kind.lower()
    except Exception:
        return 1
    single_tc = ("v5 lite", "v5litepod", "v5e", "v6 lite", "v6e", "trillium")
    return 1 if any(tag in kind for tag in single_tc) else 2


def _fused_convt_kernel(xp_ref, w1_ref, w2_ref, b2_ref, o_ref, t4s_ref, *, slope):
    """Both ConvTranspose2d(k=2, s=1) layers + leaky selects, fused.

    xp_ref : (B, H+2, WP, C)  layer-1 zero-padded input: x at rows 1..H,
                              cols 1..W, channels 0..Cin-1; zeros elsewhere.
                              WP % 8 == 0 and WP >= W+2.
    w*_ref : (2, C, 2C)       packed taps: w[p] = [tap(p,q=0) | tap(p,q=1)],
                              tap(p,q) = spatially flipped kernel slice.
    b2_ref : (1, C)           layer-2 bias (zero padded to C lanes).
    o_ref  : (B, H+2, WP, C)  layer-2 output; valid region rows 0..H+1,
                              cols 0..W+1, channels 0..Cout-1.
    t4s_ref: (B, H+3, WP, C)  f32 scratch holding the row-padded layer-2 input.
    """
    b, h2, wp, c = xp_ref.shape          # h2 = H + 2
    ho1 = h2 - 1                         # layer-1 output rows = H + 1
    leaky = lambda v: jnp.where(v > 0, v, v * slope)

    # ---------------- layer 1: split-K over the two h-taps ----------------
    a0 = xp_ref[:, 0:ho1]                # padded rows i     (leading-axis view)
    a1 = xp_ref[:, 1:h2]                 # padded rows i + 1
    r1 = jnp.dot(a0.reshape(b * ho1 * wp, c), w1_ref[0],
                 preferred_element_type=jnp.float32)
    r1 += jnp.dot(a1.reshape(b * ho1 * wp, c), w1_ref[1],
                  preferred_element_type=jnp.float32)
    r1 = r1.reshape(b, ho1, wp, 2 * c)
    # Combine the two w-taps.  INVARIANT the +1 roll relies on: xp column 0 and
    # column wp-1 are exactly zero (leading pad of 1, trailing pad >= 1 col),
    # so the wrapped-around sublane at column 0 contributes 0.  The rolled
    # layout places t4 directly at the padded-column positions layer 2 needs
    # (column 0 and the trailing columns stay exactly zero; leaky(0) == 0).
    t4 = leaky(pltpu.roll(r1[..., 0:c], shift=1, axis=2) + r1[..., c:2 * c])

    # -------- layer 2: t4 goes into a zero-bordered VMEM scratch --------
    zrow = jnp.zeros((b, 1, wp, c), jnp.float32)
    t4s_ref[:, 0:1] = zrow               # top zero row
    t4s_ref[:, h2:h2 + 1] = zrow         # bottom zero row
    t4s_ref[:, 1:h2] = t4                # t4 rows 0..H land at rows 1..H+1
    b0 = t4s_ref[:, 0:h2]                # padded rows i     (leading-axis view)
    b1 = t4s_ref[:, 1:h2 + 1]            # padded rows i + 1
    r2 = jnp.dot(b0.reshape(b * h2 * wp, c), w2_ref[0],
                 preferred_element_type=jnp.float32)
    r2 += jnp.dot(b1.reshape(b * h2 * wp, c), w2_ref[1],
                  preferred_element_type=jnp.float32)
    r2 = r2.reshape(b, h2, wp, 2 * c)
    # INVARIANT: t4 column 0 is exactly zero, so the -1 roll's wrap-around
    # column contributes 0.  Bias must be added AFTER the roll/tap combine.
    y2 = r2[..., 0:c] + pltpu.roll(r2[..., c:2 * c], shift=wp - 1, axis=2)
    o_ref[...] = leaky(y2 + b2_ref[...])     # lane-dense, sublane-aligned store


def _pack_taps(w_torch, c):
    """(Cin, Cout, 2, 2) PyTorch ConvTranspose2d weight -> packed (2, c, 2c)."""
    cin, cout = w_torch.shape[0], w_torch.shape[1]
    w = w_torch.astype(jnp.float32)

    def tap(p, q):      # conv-transpose == conv with the spatially flipped kernel
        return jnp.pad(w[:, :, 1 - p, 1 - q], ((0, c - cin), (0, c - cout)))

    return jnp.stack(
        [jnp.concatenate([tap(0, 0), tap(0, 1)], axis=1),
         jnp.concatenate([tap(1, 0), tap(1, 1)], axis=1)], axis=0)


@functools.partial(jax.jit, static_argnames=("batch_block",))
def _forward_impl(x_nchw, params, *, batch_block):
    n, cin, h, w = x_nchw.shape
    cout = params["w2"].shape[1]
    c = LANE
    assert cin <= c and params["w1"].shape[1] <= c and cout <= c
    wp = _round_up(w + 2, 8)             # sublane-aligned padded width (>= W+2)

    # NCHW -> NHWC + single zero-pad into the kernel layout (one fused XLA op).
    x = jnp.transpose(x_nchw, (0, 2, 3, 1)).astype(jnp.float32)
    xp = jnp.pad(x, ((0, 0), (1, 1), (1, wp - 1 - w), (0, c - cin)))

    w1p = _pack_taps(params["w1"], c)
    w2p = _pack_taps(params["w2"], c)
    b2p = jnp.pad(params["b2"].astype(jnp.float32), (0, c - cout)).reshape(1, c)

    bb = batch_block
    out = pl.pallas_call(
        functools.partial(_fused_convt_kernel, slope=NEGATIVE_SLOPE),
        grid=(n // bb,),
        out_shape=jax.ShapeDtypeStruct((n, h + 2, wp, c), jnp.float32),
        in_specs=[
            pl.BlockSpec((bb, h + 2, wp, c), lambda i: (i, 0, 0, 0)),
            # Constant index maps: weights/bias are DMA'd once and re-used
            # across grid steps (no refetch even when grid > 1).
            pl.BlockSpec((2, c, 2 * c), lambda i: (0, 0, 0)),
            pl.BlockSpec((2, c, 2 * c), lambda i: (0, 0, 0)),
            pl.BlockSpec((1, c), lambda i: (0, 0)),
        ],
        out_specs=pl.BlockSpec((bb, h + 2, wp, c), lambda i: (i, 0, 0, 0)),
        scratch_shapes=[pltpu.VMEM((bb, h + 3, wp, c), jnp.float32)],
        compiler_params=pltpu.CompilerParams(
            dimension_semantics=("parallel",)),
    )(xp, w1p, w2p, b2p)

    # NOTE: the padded columns/channels of the raw kernel output contain
    # leaky(bias), not zeros — they are sliced off here (fused with the
    # NHWC->NCHW transpose under jit).  Don't consume the raw kernel output.
    return jnp.transpose(out[:, :, :w + 2, :cout], (0, 3, 1, 2))


def model_forward(x_nchw, params):
    """Matches Model.forward; input/output are NCHW like PyTorch."""
    n = x_nchw.shape[0]
    # v5e/v6e (single TensorCore): fold the whole batch into one grid step so
    # batch rows become extra matmul M rows and there is no per-step overhead.
    # v7x (two TensorCores): one batch element per grid step; the "parallel"
    # grid axis gives each TC one element.
    batch_block = n if _tensorcores_per_chip() == 1 else 1
    if n % batch_block != 0:
        batch_block = 1
    return _forward_impl(x_nchw, params, batch_block=batch_block)


# ---------------- pure-JAX reference (scatter formulation) ----------------
def _ref_convt(x_nhwc, w_torch, bias):
    N, H, W, Cin = x_nhwc.shape
    Cout = w_torch.shape[1]
    out = jnp.zeros((N, H + 1, W + 1, Cout), jnp.float32)
    for p in range(2):
        for q in range(2):
            y = jnp.einsum("nhwc,cd->nhwd", x_nhwc, w_torch[:, :, p, q],
                           precision=jax.lax.Precision.HIGHEST)
            out = out.at[:, p:p + H, q:q + W, :].add(y)
    if bias is not None:
        out = out + bias
    return out


def _ref_forward(x_nchw, params):
    x = jnp.transpose(x_nchw, (0, 2, 3, 1)).astype(jnp.float32)
    t1 = _ref_convt(x, params["w1"], None)
    t4 = jnp.where(t1 > 0, t1, t1 * NEGATIVE_SLOPE)
    t5 = _ref_convt(t4, params["w2"], params["b2"])
    t8 = jnp.where(t5 > 0, t5, t5 * NEGATIVE_SLOPE)
    return jnp.transpose(t8, (0, 3, 1, 2))


if __name__ == "__main__":
    key = jax.random.PRNGKey(0)
    k_x, k_w1, k_w2, k_b2 = jax.random.split(key, 4)

    # Channels fixed by the module (101 -> 62 -> 62); small spatial/batch.
    N, Cin, H, W = 2, 101, 8, 8
    x = jax.random.normal(k_x, (N, Cin, H, W), jnp.float32)

    params = {
        # PyTorch ConvTranspose2d weight layout: (in_ch, out_ch, kH, kW)
        "w1": 0.05 * jax.random.normal(k_w1, (101, 62, 2, 2), jnp.float32),
        "w2": 0.05 * jax.random.normal(k_w2, (62, 62, 2, 2), jnp.float32),
        "b2": 0.05 * jax.random.normal(k_b2, (62,), jnp.float32),
    }

    out = jax.block_until_ready(model_forward(x, params))
    ref = jax.block_until_ready(_ref_forward(x, params))

    assert out.shape == (N, 62, H + 2, W + 2), out.shape
    err = float(jnp.max(jnp.abs(out - ref)))
    assert err < 2e-3, err
    print("KERNEL_OK")
</pallas_src>

<mosaic_0001>
module attributes {stable_mosaic.version = 11 : i64} {
  func.func @_fused_convt_kernel(%arg0: i32, %arg1: memref<1x10x16x128xf32, #tpu.memory_space<vmem>>, %arg2: memref<2x128x256xf32, #tpu.memory_space<vmem>>, %arg3: memref<2x128x256xf32, #tpu.memory_space<vmem>>, %arg4: memref<1x128xf32, #tpu.memory_space<vmem>>, %arg5: memref<1x10x16x128xf32, #tpu.memory_space<vmem>>, %arg6: memref<1x11x16x128xf32, #tpu.memory_space<vmem>>) attributes {dimension_semantics = [#tpu.dimension_semantics<parallel>], iteration_bounds = array<i64: 2>, scalar_prefetch = 0 : i64, scratch_operands = 1 : i64, tpu.core_type = #tpu.core_type<tc>, window_params = [{transform_indices = @transform_0, window_bounds = array<i64: 1, 10, 16, 128>}, {pipeline_mode = #tpu.pipeline_mode<synchronous>, transform_indices = @transform_1, window_bounds = array<i64: 2, 128, 256>}, {pipeline_mode = #tpu.pipeline_mode<synchronous>, transform_indices = @transform_2, window_bounds = array<i64: 2, 128, 256>}, {pipeline_mode = #tpu.pipeline_mode<synchronous>, transform_indices = @transform_3, window_bounds = array<i64: 1, 128>}, {transform_indices = @transform_4, window_bounds = array<i64: 1, 10, 16, 128>}]} {
    %c0 = arith.constant 0 : index
    %c0_0 = arith.constant 0 : index
    %c0_1 = arith.constant 0 : index
    %c0_2 = arith.constant 0 : index
    %0 = vector.load %arg1[%c0, %c0_0, %c0_1, %c0_2] : memref<1x10x16x128xf32, #tpu.memory_space<vmem>>, vector<1x9x16x128xf32>
    %c0_3 = arith.constant 0 : index
    %c1 = arith.constant 1 : index
    %c0_4 = arith.constant 0 : index
    %c0_5 = arith.constant 0 : index
    %1 = vector.load %arg1[%c0_3, %c1, %c0_4, %c0_5] : memref<1x10x16x128xf32, #tpu.memory_space<vmem>>, vector<1x9x16x128xf32>
    %2 = vector.shape_cast %0 : vector<1x9x16x128xf32> to vector<144x128xf32>
    %c0_6 = arith.constant 0 : index
    %c0_7 = arith.constant 0 : index
    %c0_8 = arith.constant 0 : index
    %3 = vector.load %arg2[%c0_6, %c0_7, %c0_8] : memref<2x128x256xf32, #tpu.memory_space<vmem>>, vector<1x128x256xf32>
    %4 = vector.shape_cast %3 : vector<1x128x256xf32> to vector<128x256xf32>
    %cst = arith.constant dense<0.000000e+00> : vector<144x256xf32>
    %5 = tpu.matmul %2, %4, %cst {dimension_numbers = #tpu.dot_dimension_numbers<[1], [0], [0], [1], [0, 0, 1, 1], [], []>} : vector<144x128xf32>, vector<128x256xf32>, vector<144x256xf32> -> vector<144x256xf32>
    %6 = vector.shape_cast %1 : vector<1x9x16x128xf32> to vector<144x128xf32>
    %c1_9 = arith.constant 1 : index
    %c0_10 = arith.constant 0 : index
    %c0_11 = arith.constant 0 : index
    %7 = vector.load %arg2[%c1_9, %c0_10, %c0_11] : memref<2x128x256xf32, #tpu.memory_space<vmem>>, vector<1x128x256xf32>
    %8 = vector.shape_cast %7 : vector<1x128x256xf32> to vector<128x256xf32>
    %cst_12 = arith.constant dense<0.000000e+00> : vector<144x256xf32>
    %9 = tpu.matmul %6, %8, %cst_12 {dimension_numbers = #tpu.dot_dimension_numbers<[1], [0], [0], [1], [0, 0, 1, 1], [], []>} : vector<144x128xf32>, vector<128x256xf32>, vector<144x256xf32> -> vector<144x256xf32>
    %10 = arith.addf %5, %9 : vector<144x256xf32>
    %11 = vector.shape_cast %10 : vector<144x256xf32> to vector<1x9x16x256xf32>
    %12 = vector.extract_strided_slice %11 {offsets = [0, 0, 0, 0], sizes = [1, 9, 16, 128], strides = [1, 1, 1, 1]} : vector<1x9x16x256xf32> to vector<1x9x16x128xf32>
    %c1_i32 = arith.constant 1 : i32
    %13 = tpu.dynamic_rotate %12 by %c1_i32 dim 2 : vector<1x9x16x128xf32>, i32 -> vector<1x9x16x128xf32>
    %14 = vector.extract_strided_slice %11 {offsets = [0, 0, 0, 128], sizes = [1, 9, 16, 128], strides = [1, 1, 1, 1]} : vector<1x9x16x256xf32> to vector<1x9x16x128xf32>
    %15 = arith.addf %13, %14 : vector<1x9x16x128xf32>
    %cst_13 = arith.constant 0.000000e+00 : f32
    %16 = vector.broadcast %cst_13 : f32 to vector<1x9x16x128xf32>
    %17 = arith.cmpf ogt, %15, %16 : vector<1x9x16x128xf32>
    %cst_14 = arith.constant 0.819999992 : f32
    %18 = vector.broadcast %cst_14 : f32 to vector<1x9x16x128xf32>
    %19 = arith.mulf %15, %18 : vector<1x9x16x128xf32>
    %20 = arith.select %17, %15, %19 : vector<1x9x16x128xi1>, vector<1x9x16x128xf32>
    %cst_15 = arith.constant 0.000000e+00 : f32
    %21 = vector.broadcast %cst_15 : f32 to vector<1x1x16x128xf32>
    %c0_16 = arith.constant 0 : index
    %c0_17 = arith.constant 0 : index
    %c0_18 = arith.constant 0 : index
    %c0_19 = arith.constant 0 : index
    %22 = vector.load %arg6[%c0_16, %c0_17, %c0_18, %c0_19] : memref<1x11x16x128xf32, #tpu.memory_space<vmem>>, vector<1x1x16x128xf32>
    tpu.vector_store %arg6[%c0_16, %c0_17, %c0_18, %c0_19], %21 {strides = array<i32>} : memref<1x11x16x128xf32, #tpu.memory_space<vmem>>, vector<1x1x16x128xf32>,
    %c0_20 = arith.constant 0 : index
    %c10 = arith.constant 10 : index
    %c0_21 = arith.constant 0 : index
    %c0_22 = arith.constant 0 : index
    %23 = vector.load %arg6[%c0_20, %c10, %c0_21, %c0_22] : memref<1x11x16x128xf32, #tpu.memory_space<vmem>>, vector<1x1x16x128xf32>
    tpu.vector_store %arg6[%c0_20, %c10, %c0_21, %c0_22], %21 {strides = array<i32>} : memref<1x11x16x128xf32, #tpu.memory_space<vmem>>, vector<1x1x16x128xf32>,
    %c0_23 = arith.constant 0 : index
    %c1_24 = arith.constant 1 : index
    %c0_25 = arith.constant 0 : index
    %c0_26 = arith.constant 0 : index
    %24 = vector.load %arg6[%c0_23, %c1_24, %c0_25, %c0_26] : memref<1x11x16x128xf32, #tpu.memory_space<vmem>>, vector<1x9x16x128xf32>
    tpu.vector_store %arg6[%c0_23, %c1_24, %c0_25, %c0_26], %20 {strides = array<i32>} : memref<1x11x16x128xf32, #tpu.memory_space<vmem>>, vector<1x9x16x128xf32>,
    %c0_27 = arith.constant 0 : index
    %c0_28 = arith.constant 0 : index
    %c0_29 = arith.constant 0 : index
    %c0_30 = arith.constant 0 : index
    %25 = vector.load %arg6[%c0_27, %c0_28, %c0_29, %c0_30] : memref<1x11x16x128xf32, #tpu.memory_space<vmem>>, vector<1x10x16x128xf32>
    %c0_31 = arith.constant 0 : index
    %c1_32 = arith.constant 1 : index
    %c0_33 = arith.constant 0 : index
    %c0_34 = arith.constant 0 : index
    %26 = vector.load %arg6[%c0_31, %c1_32, %c0_33, %c0_34] : memref<1x11x16x128xf32, #tpu.memory_space<vmem>>, vector<1x10x16x128xf32>
    %27 = vector.shape_cast %25 : vector<1x10x16x128xf32> to vector<160x128xf32>
    %c0_35 = arith.constant 0 : index
    %c0_36 = arith.constant 0 : index
    %c0_37 = arith.constant 0 : index
    %28 = vector.load %arg3[%c0_35, %c0_36, %c0_37] : memref<2x128x256xf32, #tpu.memory_space<vmem>>, vector<1x128x256xf32>
    %29 = vector.shape_cast %28 : vector<1x128x256xf32> to vector<128x256xf32>
    %cst_38 = arith.constant dense<0.000000e+00> : vector<160x256xf32>
    %30 = tpu.matmul %27, %29, %cst_38 {dimension_numbers = #tpu.dot_dimension_numbers<[1], [0], [0], [1], [0, 0, 1, 1], [], []>} : vector<160x128xf32>, vector<128x256xf32>, vector<160x256xf32> -> vector<160x256xf32>
    %31 = vector.shape_cast %26 : vector<1x10x16x128xf32> to vector<160x128xf32>
    %c1_39 = arith.constant 1 : index
    %c0_40 = arith.constant 0 : index
    %c0_41 = arith.constant 0 : index
    %32 = vector.load %arg3[%c1_39, %c0_40, %c0_41] : memref<2x128x256xf32, #tpu.memory_space<vmem>>, vector<1x128x256xf32>
    %33 = vector.shape_cast %32 : vector<1x128x256xf32> to vector<128x256xf32>
    %cst_42 = arith.constant dense<0.000000e+00> : vector<160x256xf32>
    %34 = tpu.matmul %31, %33, %cst_42 {dimension_numbers = #tpu.dot_dimension_numbers<[1], [0], [0], [1], [0, 0, 1, 1], [], []>} : vector<160x128xf32>, vector<128x256xf32>, vector<160x256xf32> -> vector<160x256xf32>
    %35 = arith.addf %30, %34 : vector<160x256xf32>
    %36 = vector.shape_cast %35 : vector<160x256xf32> to vector<1x10x16x256xf32>
    %37 = vector.extract_strided_slice %36 {offsets = [0, 0, 0, 0], sizes = [1, 10, 16, 128], strides = [1, 1, 1, 1]} : vector<1x10x16x256xf32> to vector<1x10x16x128xf32>
    %38 = vector.extract_strided_slice %36 {offsets = [0, 0, 0, 128], sizes = [1, 10, 16, 128], strides = [1, 1, 1, 1]} : vector<1x10x16x256xf32> to vector<1x10x16x128xf32>
    %c15_i32 = arith.constant 15 : i32
    %39 = tpu.dynamic_rotate %38 by %c15_i32 dim 2 : vector<1x10x16x128xf32>, i32 -> vector<1x10x16x128xf32>
    %40 = arith.addf %37, %39 : vector<1x10x16x128xf32>
    %c0_43 = arith.constant 0 : index
    %c0_44 = arith.constant 0 : index
    %41 = vector.load %arg4[%c0_43, %c0_44] : memref<1x128xf32, #tpu.memory_space<vmem>>, vector<1x128xf32>
    %42 = vector.shape_cast %41 : vector<1x128xf32> to vector<1x1x1x128xf32>
    %43 = vector.broadcast %42 : vector<1x1x1x128xf32> to vector<1x10x16x128xf32>
    %44 = arith.addf %40, %43 : vector<1x10x16x128xf32>
    %cst_45 = arith.constant 0.000000e+00 : f32
    %45 = vector.broadcast %cst_45 : f32 to vector<1x10x16x128xf32>
    %46 = arith.cmpf ogt, %44, %45 : vector<1x10x16x128xf32>
    %cst_46 = arith.constant 0.819999992 : f32
    %47 = vector.broadcast %cst_46 : f32 to vector<1x10x16x128xf32>
    %48 = arith.mulf %44, %47 : vector<1x10x16x128xf32>
    %49 = arith.select %46, %44, %48 : vector<1x10x16x128xi1>, vector<1x10x16x128xf32>
    %c0_47 = arith.constant 0 : index
    %c0_48 = arith.constant 0 : index
    %c0_49 = arith.constant 0 : index
    %c0_50 = arith.constant 0 : index
    %50 = vector.load %arg5[%c0_47, %c0_48, %c0_49, %c0_50] : memref<1x10x16x128xf32, #tpu.memory_space<vmem>>, vector<1x10x16x128xf32>
    tpu.vector_store %arg5[%c0_47, %c0_48, %c0_49, %c0_50], %49 {strides = array<i32>} : memref<1x10x16x128xf32, #tpu.memory_space<vmem>>, vector<1x10x16x128xf32>,
    return
  }
  func.func @transform_0(%arg0: i32) -> (i32, i32, i32, i32) {
    %c0_i32 = arith.constant 0 : i32
    %c0_i32_0 = arith.constant 0 : i32
    %c0_i32_1 = arith.constant 0 : i32
    %c0_i32_2 = arith.constant 0 : i32
    return %arg0, %c0_i32, %c0_i32_0, %c0_i32_1 : i32, i32, i32, i32
  }
  func.func @transform_1(%arg0: i32) -> (i32, i32, i32) {
    %c0_i32 = arith.constant 0 : i32
    %c0_i32_0 = arith.constant 0 : i32
    %c0_i32_1 = arith.constant 0 : i32
    %c0_i32_2 = arith.constant 0 : i32
    return %c0_i32, %c0_i32_0, %c0_i32_1 : i32, i32, i32
  }
  func.func @transform_2(%arg0: i32) -> (i32, i32, i32) {
    %c0_i32 = arith.constant 0 : i32
    %c0_i32_0 = arith.constant 0 : i32
    %c0_i32_1 = arith.constant 0 : i32
    %c0_i32_2 = arith.constant 0 : i32
    return %c0_i32, %c0_i32_0, %c0_i32_1 : i32, i32, i32
  }
  func.func @transform_3(%arg0: i32) -> (i32, i32) {
    %c0_i32 = arith.constant 0 : i32
    %c0_i32_0 = arith.constant 0 : i32
    %c0_i32_1 = arith.constant 0 : i32
    return %c0_i32, %c0_i32_0 : i32, i32
  }
  func.func @transform_4(%arg0: i32) -> (i32, i32, i32, i32) {
    %c0_i32 = arith.constant 0 : i32
    %c0_i32_0 = arith.constant 0 : i32
    %c0_i32_1 = arith.constant 0 : i32
    %c0_i32_2 = arith.constant 0 : i32
    return %arg0, %c0_i32, %c0_i32_0, %c0_i32_1 : i32, i32, i32, i32
  }
}

</mosaic_0001>

<bundles_post_ra>
// kernel: _forward_impl.1
= control target key start
LH: loop header
LB: loop body
LE: loop exit
PB: predicated region body
PF: predicated region fallthrough
CT: control target
= control target key end

     0   :  { %s1835_s15 = smov 0   ;;  %s2596_s0 = inlined_call_operand.vmem [shape: f32[2,10,16,128], index: 0, kind: input, shape index: {}]   ;;  %s2597_s1 = inlined_call_operand.vmem [shape: f32[2,128,256], index: 1, kind: input, shape index: {}]   ;;  %s2598_s2 = inlined_call_operand.vmem [shape: f32[2,128,256], index: 2, kind: input, shape index: {}]   ;;  %s2599_s3 = inlined_call_operand.vmem [shape: f32[1,128], index: 3, kind: input, shape index: {}]   ;;  %s2600_s4 = inlined_call_operand.vmem [shape: f32[2,10,16,128], index: 4, kind: output, shape index: {}]  }
   0x1 LB: > { %s1479_s16 = sadd.s32 4294967295, %s1807_s15   ;;  %p1483_p0 = scmp.ge.s32.totalorder %s1807_s15, 1  ;;  %s1807_s15 = sphi %s1835_s15, %s14_s15  }
   0x2   : > { %p162_p1 = scmp.lt.s32.totalorder %s1807_s15, 3 }
   0x4   : > { %p163_p2 = pnand %p1483_p0, %p162_p1 }
   0x5   : > { %v1505_v0 = vld [vmem:[%s2597_s1 + $0x108] sm:$0xff] (!%p163_p2)  ;;  %v1507_v1 = vld [vmem:[%s2597_s1 + $0x118] sm:$0xff] (!%p163_p2)  ;;  %v1504_v2 = vld [vmem:[%s2597_s1 + $0x100] sm:$0xff] (!%p163_p2)  ;;  %v1809_v7 = vmov (!%p163_p2), 0.0   ;;  %p188_p3 = scmp.lt.s32.totalorder (!%p163_p2), %s1479_s16, 1 }
   0x6   : > { %166 = sbr.rel (%p163_p2) target bundleno = 717 (0x2cd), region = 36  ;;  %v1571_v3 = vpack.c.bf16 (!%p163_p2), %v1507_v1, %v1505_v0  ;;  %v1506_v4 = vld [vmem:[%s2597_s1 + $0x110] sm:$0xff] (!%p163_p2)  ;;  %v1509_v5 = vld [vmem:[%s2597_s1 + $0x128] sm:$0xff] (!%p163_p2)  ;;  %v1511_v6 = vld [vmem:[%s2597_s1 + $0x138] sm:$0xff] (!%p163_p2)  ;;  %364 = vmatprep.mubr.f32.mxu0 (!%p163_p2), %v1809_v7  ;;  %962 = vmatprep.mubr.f32.mxu1 (!%p163_p2), %v1809_v7 }
   0x7   : > { %v1573_v8 = vpack.c.bf16 (!%p163_p2), %v1506_v4, %v1504_v2  ;;  %v1575_v9 = vpack.c.bf16 (!%p163_p2), %v1511_v6, %v1509_v5  ;;  %v1508_v10 = vld [vmem:[%s2597_s1 + $0x120] sm:$0xff] (!%p163_p2)  ;;  %v1510_v11 = vld [vmem:[%s2597_s1 + $0x130] sm:$0xff] (!%p163_p2)  ;;  %v1513_v12 = vld [vmem:[%s2597_s1 + $0x148] sm:$0xff] (!%p163_p2) }
   0x8   : > { %1572 = vmatprep.subr.bf16.mxu0 (!%p163_p2), %v1571_v3  ;;  %v1515_v13 = vld [vmem:[%s2597_s1 + $0x158] sm:$0xff] (!%p163_p2)  ;;  %v1577_v14 = vpack.c.bf16 (!%p163_p2), %v1510_v11, %v1508_v10  ;;  %v1512_v16 = vld [vmem:[%s2597_s1 + $0x140] sm:$0xff] (!%p163_p2)  ;;  %v1514_v17 = vld [vmem:[%s2597_s1 + $0x150] sm:$0xff] (!%p163_p2) }
   0x9   : > { %1574 = vmatpush1.bf16.msra.mxu0 (!%p163_p2), %v1573_v8  ;;  %v1579_v15 = vpack.c.bf16 (!%p163_p2), %v1515_v13, %v1513_v12  ;;  %v1517_v18 = vld [vmem:[%s2597_s1 + $0x168] sm:$0xff] (!%p163_p2)  ;;  %v1519_v19 = vld [vmem:[%s2597_s1 + $0x178] sm:$0xff] (!%p163_p2)  ;;  %v1581_v20 = vpack.c.bf16 (!%p163_p2), %v1514_v17, %v1512_v16  ;;  %v1516_v22 = vld [vmem:[%s2597_s1 + $0x160] sm:$0xff] (!%p163_p2) }
   0xa   : > { %1576 = vmatprep.subr.bf16.mxu0 (!%p163_p2), %v1575_v9  ;;  %v1583_v21 = vpack.c.bf16 (!%p163_p2), %v1519_v19, %v1517_v18  ;;  %v1518_v23 = vld [vmem:[%s2597_s1 + $0x170] sm:$0xff] (!%p163_p2)  ;;  %v1521_v24 = vld [vmem:[%s2597_s1 + $0x188] sm:$0xff] (!%p163_p2)  ;;  %v1523_v25 = vld [vmem:[%s2597_s1 + $0x198] sm:$0xff] (!%p163_p2) }
   0xb   : > { %v1585_v26 = vpack.c.bf16 (!%p163_p2), %v1518_v23, %v1516_v22  ;;  %v1587_v27 = vpack.c.bf16 (!%p163_p2), %v1523_v25, %v1521_v24  ;;  %v1520_v28 = vld [vmem:[%s2597_s1 + $0x180] sm:$0xff] (!%p163_p2)  ;;  %v1522_v29 = vld [vmem:[%s2597_s1 + $0x190] sm:$0xff] (!%p163_p2)  ;;  %v1525_v30 = vld [vmem:[%s2597_s1 + $0x1a8] sm:$0xff] (!%p163_p2) }
   0xc   : > { %v1527_v31 = vld [vmem:[%s2597_s1 + $0x1b8] sm:$0xff] (!%p163_p2)  ;;  %v1589_v32 = vpack.c.bf16 (!%p163_p2), %v1522_v29, %v1520_v28  ;;  %v1524_v34 = vld [vmem:[%s2597_s1 + $0x1a0] sm:$0xff] (!%p163_p2)  ;;  %v1526_v35 = vld [vmem:[%s2597_s1 + $0x1b0] sm:$0xff] (!%p163_p2) }
   0xd   : > { %1578 = vmatpush1.bf16.msra.mxu0 %v1577_v14  ;;  %v1591_v33 = vpack.c.bf16 %v1527_v31, %v1525_v30  ;;  %v1529_v36 = vld [vmem:[%s2597_s1 + $0x1c8] sm:$0xff]  ;;  %v1531_v37 = vld [vmem:[%s2597_s1 + $0x1d8] sm:$0xff]  ;;  %v1593_v38 = vpack.c.bf16 %v1526_v35, %v1524_v34  ;;  %v1528_v40 = vld [vmem:[%s2597_s1 + $0x1c0] sm:$0xff]  ;;  %s2602_s16 = smov (!%p188_p3, %s1479_s16), 1 }
   0xe   : > { %1580 = vmatprep.subr.bf16.mxu0 %v1579_v15  ;;  %v1595_v39 = vpack.c.bf16 %v1531_v37, %v1529_v36  ;;  %v1530_v41 = vld [vmem:[%s2597_s1 + $0x1d0] sm:$0xff]  ;;  %v1533_v42 = vld [vmem:[%s2597_s1 + $0x1e8] sm:$0xff]  ;;  %v1535_v43 = vld [vmem:[%s2597_s1 + $0x1f8] sm:$0xff]  ;;  %s1791_s7 = smul.u32 160, %s2602_s16 }
   0xf   : > { %v1597_v44 = vpack.c.bf16 %v1530_v41, %v1528_v40  ;;  %v1599_v45 = vpack.c.bf16 %v1535_v43, %v1533_v42  ;;  %v1532_v46 = vld [vmem:[%s2597_s1 + $0x1e0] sm:$0xff]  ;;  %v1534_v47 = vld [vmem:[%s2597_s1 + $0x1f0] sm:$0xff]  ;;  %v236_v48 = vld [vmem:[%s2597_s1 + $0x8] sm:$0xff] }
  0x10   : > { %v238_v49 = vld [vmem:[%s2597_s1 + $0x18] sm:$0xff]  ;;  %v1601_v50 = vpack.c.bf16 %v1534_v47, %v1532_v46  ;;  %s1959_s14 = scalar_lea.vmem %s2596_s0, %s1791_s7  ;;  %v235_v52 = vld [vmem:[%s2597_s1] sm:$0xff]  ;;  %v237_v53 = vld [vmem:[%s2597_s1 + $0x10] sm:$0xff] }
  0x11   : > { %1582 = vmatpush1.bf16.msra.mxu0 %v1581_v20  ;;  %v1603_v51 = vpack.c.bf16 %v238_v49, %v236_v48  ;;  %v240_v54 = vld [vmem:[%s2597_s1 + $0x28] sm:$0xff]  ;;  %v242_v55 = vld [vmem:[%s2597_s1 + $0x38] sm:$0xff]  ;;  %v1974_v56 = vld [vmem:[%s1959_s14 + $0x10] sm:$0xff]  ;;  %v1605_v57 = vpack.c.bf16 %v237_v53, %v235_v52 }
  0x12   : > { %1584 = vmatprep.subr.bf16.mxu0 %v1583_v21  ;;  %v1607_v58 = vpack.c.bf16 %v242_v55, %v240_v54  ;;  %v239_v59 = vld [vmem:[%s2597_s1 + $0x20] sm:$0xff]  ;;  %v241_v60 = vld [vmem:[%s2597_s1 + $0x30] sm:$0xff]  ;;  %v244_v61 = vld [vmem:[%s2597_s1 + $0x48] sm:$0xff] }
  0x13   : > { %v246_v62 = vld [vmem:[%s2597_s1 + $0x58] sm:$0xff]  ;;  %v1609_v0 = vpack.c.bf16 %v241_v60, %v239_v59  ;;  %v243_v2 = vld [vmem:[%s2597_s1 + $0x40] sm:$0xff]  ;;  %v245_v3 = vld [vmem:[%s2597_s1 + $0x50] sm:$0xff] }
  0x14   : > { %v1991_v63 = vld [vmem:[%s1959_s14 + $0x18] sm:$0xff]  ;;  %v1611_v1 = vpack.c.bf16 %v246_v62, %v244_v61  ;;  %v248_v4 = vld [vmem:[%s2597_s1 + $0x68] sm:$0xff]  ;;  %v2008_v6 = vld [vmem:[%s1959_s14 + $0x20] sm:$0xff]  ;;  %v1613_v8 = vpack.c.bf16 %v245_v3, %v243_v2 }
  0x15   : > { %1586 = vmatpush1.bf16.msra.mxu0 %v1585_v26  ;;  %v250_v5 = vld [vmem:[%s2597_s1 + $0x78] sm:$0xff]  ;;  %v247_v10 = vld [vmem:[%s2597_s1 + $0x60] sm:$0xff]  ;;  %v249_v11 = vld [vmem:[%s2597_s1 + $0x70] sm:$0xff] }
  0x16   : > { %1588 = vmatprep.subr.bf16.mxu0 %v1587_v27  ;;  %v1615_v9 = vpack.c.bf16 %v250_v5, %v248_v4  ;;  %v252_v12 = vld [vmem:[%s2597_s1 + $0x88] sm:$0xff]  ;;  %v254_v13 = vld [vmem:[%s2597_s1 + $0x98] sm:$0xff]  ;;  %v1617_v15 = vpack.c.bf16 %v249_v11, %v247_v10  ;;  %v251_v17 = vld [vmem:[%s2597_s1 + $0x80] sm:$0xff] }
  0x17   : > { %v2025_v14 = vld [vmem:[%s1959_s14 + $0x28] sm:$0xff]  ;;  %v1619_v16 = vpack.c.bf16 %v254_v13, %v252_v12  ;;  %v253_v18 = vld [vmem:[%s2597_s1 + $0x90] sm:$0xff]  ;;  %v258_v21 = vld [vmem:[%s2597_s1 + $0xb8] sm:$0xff] }
  0x18   : > { %v2034_v19 = vld [vmem:[%s1959_s14 + $0x30] sm:$0xff]  ;;  %v256_v20 = vld [vmem:[%s2597_s1 + $0xa8] sm:$0xff]  ;;  %v1539_v23 = vld [vmem:[%s2598_s2 + $0x118] sm:$0xff]  ;;  %v1621_v25 = vpack.c.bf16 %v253_v18, %v251_v17 }
  0x19   : > { %1590 = vmatpush1.bf16.msra.mxu0 %v1589_v32  ;;  %v1537_v22 = vld [vmem:[%s2598_s2 + $0x108] sm:$0xff]  ;;  %v1536_v24 = vld [vmem:[%s2598_s2 + $0x100] sm:$0xff]  ;;  %v1538_v27 = vld [vmem:[%s2598_s2 + $0x110] sm:$0xff]  ;;  %v1623_v30 = vpack.c.bf16 %v258_v21, %v256_v20 }
  0x1a   : > { %1592 = vmatprep.subr.bf16.mxu0 %v1591_v33  ;;  %v2053_v26 = vpack.c.bf16 %v1539_v23, %v1537_v22  ;;  %v1541_v28 = vld [vmem:[%s2598_s2 + $0x128] sm:$0xff]  ;;  %v1543_v29 = vld [vmem:[%s2598_s2 + $0x138] sm:$0xff]  ;;  %v255_v31 = vld [vmem:[%s2597_s1 + $0xa0] sm:$0xff]  ;;  %v2073_v34 = vpack.c.bf16 %v1538_v27, %v1536_v24 }
  0x1b   : > { %v257_v32 = vld [vmem:[%s2597_s1 + $0xb0] sm:$0xff]  ;;  %v260_v33 = vld [vmem:[%s2597_s1 + $0xc8] sm:$0xff]  ;;  %v262_v35 = vld [vmem:[%s2597_s1 + $0xd8] sm:$0xff] }
  0x1c   : > { %v1540_v36 = vld [vmem:[%s2598_s2 + $0x120] sm:$0xff]  ;;  %v1542_v37 = vld [vmem:[%s2598_s2 + $0x130] sm:$0xff]  ;;  %1699 = vmatprep.subr.bf16.mxu1 %v2053_v26  ;;  %v1625_v40 = vpack.c.bf16 %v257_v32, %v255_v31  ;;  %v1545_v41 = vld [vmem:[%s2598_s2 + $0x148] sm:$0xff]  ;;  %v1627_v43 = vpack.c.bf16 %v262_v35, %v260_v33 }
  0x1d   : > { %1594 = vmatpush1.bf16.msra.mxu0 %v1593_v38  ;;  %v2086_v38 = vpack.c.bf16 %v1543_v29, %v1541_v28  ;;  %1707 = vmatpush1.bf16.msra.mxu1 %v2073_v34  ;;  %v1547_v42 = vld [vmem:[%s2598_s2 + $0x158] sm:$0xff]  ;;  %v264_v46 = vld [vmem:[%s2597_s1 + $0xe8] sm:$0xff]  ;;  %v2108_v47 = vpack.c.bf16 %v1542_v37, %v1540_v36  ;;  %v1544_v49 = vld [vmem:[%s2598_s2 + $0x140] sm:$0xff] }
  0x1e   : > { %1596 = vmatprep.subr.bf16.mxu0 %v1595_v39  ;;  %v2091_v39 = vld [vmem:[%s1959_s14 + $0x38] sm:$0xff]  ;;  %v2126_v52 = vld [vmem:[%s1959_s14 + $0x40] sm:$0xff]  ;;  %v1549_v54 = vld [vmem:[%s2598_s2 + $0x168] sm:$0xff] }
  0x1f   : > { %1700 = vmatprep.subr.bf16.mxu1 %v2086_v38  ;;  %v266_v48 = vld [vmem:[%s2597_s1 + $0xf8] sm:$0xff]  ;;  %v265_v59 = vld [vmem:[%s2597_s1 + $0xf0] sm:$0xff]  ;;  %v1548_v61 = vld [vmem:[%s2598_s2 + $0x160] sm:$0xff] }
  0x20   : > { %v1551_v55 = vld [vmem:[%s2598_s2 + $0x178] sm:$0xff]  ;;  %v1550_v62 = vld [vmem:[%s2598_s2 + $0x170] sm:$0xff]  ;;  %v1553_v3 = vld [vmem:[%s2598_s2 + $0x188] sm:$0xff] }
  0x21   : > { %1598 = vmatpush1.bf16.msra.mxu0 %v1597_v44  ;;  %v259_v44 = vld [vmem:[%s2597_s1 + $0xc0] sm:$0xff]  ;;  %1708 = vmatpush1.bf16.msra.mxu1 %v2108_v47  ;;  %v1555_v4 = vld [vmem:[%s2598_s2 + $0x198] sm:$0xff]  ;;  %v1649_v5 = vpack.c.bf16 %v1550_v62, %v1548_v61  ;;  %v2173_v11 = vld [vmem:[%s1959_s14 + $0x50] sm:$0xff] }
  0x22   : > { %1600 = vmatprep.subr.bf16.mxu0 %v1599_v45  ;;  %v261_v45 = vld [vmem:[%s2597_s1 + $0xd0] sm:$0xff]  ;;  %v1651_v10 = vpack.c.bf16 %v1555_v4, %v1553_v3  ;;  %v1495_v13 = vld [vmem:[%s1959_s14 + $0x58] sm:$0xff]  ;;  %v1500_v20 = vld [vmem:[%s1959_s14 + $0x80] sm:$0xff] }
  0x23   : > { %v1629_v53 = vpack.c.bf16 %v261_v45, %v259_v44  ;;  %v1498_v17 = vld [vmem:[%s1959_s14 + $0x70] sm:$0xff]  ;;  %v1499_v18 = vld [vmem:[%s1959_s14 + $0x78] sm:$0xff]  ;;  %v1501_v21 = vld [vmem:[%s1959_s14 + $0x88] sm:$0xff] }
  0x24   : > { %v1502_v22 = vld [vmem:[%s1959_s14 + $0x90] sm:$0xff]  ;;  %v1503_v23 = vld [vmem:[%s1959_s14 + $0x98] sm:$0xff]  ;;  %v198_v24 = vld [vmem:[%s1959_s14] sm:$0xff] }
  0x25   : > { %1602 = vmatpush1.bf16.msra.mxu0 %v1601_v50  ;;  %v1546_v50 = vld [vmem:[%s2598_s2 + $0x150] sm:$0xff]  ;;  %v1561_v27 = vld [vmem:[%s2598_s2 + $0x1c8] sm:$0xff]  ;;  %v1563_v28 = vld [vmem:[%s2598_s2 + $0x1d8] sm:$0xff] }
  0x26   : > { %1604 = vmatprep.subr.bf16.mxu0 %v1603_v51  ;;  %v2121_v51 = vpack.c.bf16 %v1547_v42, %v1545_v41  ;;  %v2140_v60 = vpack.c.bf16 %v1546_v50, %v1544_v49  ;;  %v1659_v29 = vpack.c.bf16 %v1563_v28, %v1561_v27  ;;  %v1562_v31 = vld [vmem:[%s2598_s2 + $0x1d0] sm:$0xff]  ;;  %v1565_v33 = vld [vmem:[%s2598_s2 + $0x1e8] sm:$0xff]  ;;  %v1564_v36 = vld [vmem:[%s2598_s2 + $0x1e0] sm:$0xff]  ;;  %v664_v42 = vlaneseq }
  0x27   : > { %v1566_v37 = vld [vmem:[%s2598_s2 + $0x1f0] sm:$0xff]  ;;  %v821_v3 = vld [vmem:[%s2598_s2] sm:$0xff] }
  0x28   : > { %365 = vmatmul.mubr.f32.vlgmr.msra.gmra.mrb[0].mxu0 %v1974_v56  ;;  %1701 = vmatprep.subr.bf16.mxu1 %v2121_v51  ;;  %v2273_v44 = vshrl.u32 %v664_v42, 7  ;;  %v823_v4 = vld [vmem:[%s2598_s2 + $0x10] sm:$0xff]  ;;  %v829_v28 = vld [vmem:[%s2598_s2 + $0x40] sm:$0xff] }
  0x29   : > { %1606 = vmatpush1.bf16.msra.mxu0 %v1605_v57  ;;  %370 = vmatprep.mubr.f32.mxu0 %v1809_v7  ;;  %v1631_v57 = vpack.c.bf16 %v266_v48, %v264_v46 }
  0x2a   : > { %1608 = vmatprep.subr.bf16.mxu0 %v1607_v58  ;;  %v263_v58 = vld [vmem:[%s2597_s1 + $0xe0] sm:$0xff]  ;;  %1709 = vmatpush1.bf16.msra.mxu1 %v2140_v60  ;;  %vm666_vm0 = vcmp.lt.s32.totalorder %v2273_v44, 1 }
  0x2b   : > { %v1633_v2 = vpack.c.bf16 %v265_v59, %v263_v58 }
  0x2c   : > { %371 = vmatmul.mubr.f32.gmra.mrb[2].mxu0 %v1991_v63 }
  0x2d   : > { %376 = vmatprep.mubr.f32.mxu0 %v1809_v7  ;;  %1610 = vmatpush1.bf16.msra.mxu0 %v1609_v0  ;;  %v2150_v0 = vpack.c.bf16 %v1551_v55, %v1549_v54 }
  0x2e   : > { %1612 = vmatprep.subr.bf16.mxu0 %v1611_v1  ;;  %v2155_v1 = vld [vmem:[%s1959_s14 + $0x48] sm:$0xff] }
  0x2f   : > { %1702 = vmatprep.subr.bf16.mxu1 %v2150_v0 }
  0x30   : > { %377 = vmatmul.mubr.f32.gmra.mrb[4].mxu0 %v2008_v6  ;;  %1710 = vmatpush1.bf16.msra.mxu1 %v1649_v5 }
  0x31   : > { %382 = vmatprep.mubr.f32.mxu0 %v1809_v7  ;;  %1614 = vmatpush1.bf16.msra.mxu0 %v1613_v8  ;;  %v1552_v8 = vld [vmem:[%s2598_s2 + $0x180] sm:$0xff] }
  0x32   : > { %1616 = vmatprep.subr.bf16.mxu0 %v1615_v9  ;;  %v1554_v9 = vld [vmem:[%s2598_s2 + $0x190] sm:$0xff]  ;;  %1703 = vmatprep.subr.bf16.mxu1 %v1651_v10 }
  0x33   : > { %v1653_v12 = vpack.c.bf16 %v1554_v9, %v1552_v8 }
  0x34   : > { %383 = vmatmul.mubr.f32.gmra.mrb[6].mxu0 %v2025_v14 }
  0x35   : > { %388 = vmatprep.mubr.f32.mxu0 %v1809_v7  ;;  %1618 = vmatpush1.bf16.msra.mxu0 %v1617_v15  ;;  %v1496_v15 = vld [vmem:[%s1959_s14 + $0x60] sm:$0xff] }
  0x36   : > { %1620 = vmatprep.subr.bf16.mxu0 %v1619_v16  ;;  %1711 = vmatpush1.bf16.msra.mxu1 %v1653_v12  ;;  %v1497_v16 = vld [vmem:[%s1959_s14 + $0x68] sm:$0xff] }
  0x38   : > { %389 = vmatmul.mubr.f32.gmra.mrb[8].mxu0 %v2034_v19 }
  0x39   : > { %394 = vmatprep.mubr.f32.mxu0 %v1809_v7  ;;  %1622 = vmatpush1.bf16.msra.mxu0 %v1621_v25  ;;  %v199_v25 = vld [vmem:[%s1959_s14 + $0x8] sm:$0xff]  ;;  %s2517_s14 = scalar_lea.vmem %s2600_s4, %s1791_s7 }
  0x3a   : > { %1624 = vmatprep.subr.bf16.mxu0 %v1623_v30  ;;  %v1560_v30 = vld [vmem:[%s2598_s2 + $0x1c0] sm:$0xff] }
  0x3b   : > { %v1661_v32 = vpack.c.bf16 %v1562_v31, %v1560_v30 }
  0x3c   : > { %395 = vmatmul.mubr.f32.gmra.mrb[10].mxu0 %v2091_v39 }
  0x3d   : > { %400 = vmatprep.mubr.f32.mxu0 %v1809_v7  ;;  %1626 = vmatpush1.bf16.msra.mxu0 %v1625_v40  ;;  %v824_v40 = vld [vmem:[%s2598_s2 + $0x18] sm:$0xff] }
  0x3e   : > { %1628 = vmatprep.subr.bf16.mxu0 %v1627_v43 }
  0x40   : > { %401 = vmatmul.mubr.f32.gmra.mrb[12].mxu0 %v2126_v52 }
  0x41   : > { %406 = vmatprep.mubr.f32.mxu0 %v1809_v7  ;;  %1630 = vmatpush1.bf16.msra.mxu0 %v1629_v53 }
  0x42   : > { %1632 = vmatprep.subr.bf16.mxu0 %v1631_v57 }
  0x44   : > { %407 = vmatmul.mubr.f32.gmra.mrb[14].mxu0 %v2155_v1 }
  0x45   : > { %412 = vmatprep.mubr.f32.mxu0 %v1809_v7  ;;  %1634 = vmatpush1.bf16.msra.mxu0 %v1633_v2 }
  0x46   : > { %1636 = vmatprep.subr.bf16.mxu0 %v2053_v26 }
  0x48   : > { %413 = vmatmul.mubr.f32.gmra.mrb[16].mxu0 %v2173_v11 }
  0x49   : > { %418 = vmatprep.mubr.f32.mxu0 %v1809_v7 }
  0x4c   : > { %419 = vmatmul.mubr.f32.gmra.mrb[18].mxu0 %v1495_v13 }
  0x4d   : > { %424 = vmatprep.mubr.f32.mxu0 %v1809_v7 }
  0x50   : > { %425 = vmatmul.mubr.f32.gmra.mrb[20].mxu0 %v1496_v15 }
  0x51   : > { %430 = vmatprep.mubr.f32.mxu0 %v1809_v7 }
  0x54   : > { %431 = vmatmul.mubr.f32.gmra.mrb[22].mxu0 %v1497_v16 }
  0x55   : > { %436 = vmatprep.mubr.f32.mxu0 %v1809_v7 }
  0x58   : > { %437 = vmatmul.mubr.f32.gmra.mrb[24].mxu0 %v1498_v17 }
  0x59   : > { %442 = vmatprep.mubr.f32.mxu0 %v1809_v7 }
  0x5c   : > { %443 = vmatmul.mubr.f32.gmra.mrb[26].mxu0 %v1499_v18 }
  0x5d   : > { %448 = vmatprep.mubr.f32.mxu0 %v1809_v7 }
  0x60   : > { %449 = vmatmul.mubr.f32.gmra.mrb[28].mxu0 %v1500_v20 }
  0x61   : > { %454 = vmatprep.mubr.f32.mxu0 %v1809_v7 }
  0x64   : > { %455 = vmatmul.mubr.f32.gmra.mrb[30].mxu0 %v1501_v21 }
  0x65   : > { %460 = vmatprep.mubr.f32.mxu0 %v1809_v7 }
  0x68   : > { %461 = vmatmul.mubr.f32.gmra.mrb[32].mxu0 %v1502_v22 }
  0x69   : > { %466 = vmatprep.mubr.f32.mxu0 %v1809_v7 }
  0x6c   : > { %467 = vmatmul.mubr.f32.gmra.mrb[34].mxu0 %v1503_v23 }
  0x6d   : > { %537 = vmatprep.mubr.f32.mxu0 %v1809_v7 }
  0x70   : > { %538 = vmatmul.mubr.f32.vlgmr.msra.gmra.mrb[0].mxu0 %v198_v24  ;;  %v830_v24 = vld [vmem:[%s2598_s2 + $0x48] sm:$0xff] }
  0x71   : > { %543 = vmatprep.mubr.f32.mxu0 %v1809_v7  ;;  %1638 = vmatpush1.bf16.msra.mxu0 %v2073_v34  ;;  %v1567_v34 = vld [vmem:[%s2598_s2 + $0x1f8] sm:$0xff] }
  0x72   : > { %1640 = vmatprep.subr.bf16.mxu0 %v2086_v38  ;;  %v1663_v35 = vpack.c.bf16 %v1567_v34, %v1565_v33  ;;  %v1665_v38 = vpack.c.bf16 %v1566_v37, %v1564_v36  ;;  %v834_v34 = vld [vmem:[%s2598_s2 + $0x68] sm:$0xff] }
  0x74   : > { %544 = vmatmul.mubr.f32.gmra.mrb[2].mxu0 %v199_v25  ;;  %v832_v25 = vld [vmem:[%s2598_s2 + $0x58] sm:$0xff] }
  0x75   : > { %549 = vmatprep.mubr.f32.mxu0 %v1809_v7  ;;  %1642 = vmatpush1.bf16.msra.mxu0 %v2108_v47  ;;  %v1675_v27 = vpack.c.bf16 %v832_v25, %v830_v24 }
  0x76   : > { %1644 = vmatprep.subr.bf16.mxu0 %v2121_v51 }
  0x78   : > { %550 = vmatmul.mubr.f32.gmra.mrb[4].mxu0 %v1974_v56  ;;  %v1557_v56 = vld [vmem:[%s2598_s2 + $0x1a8] sm:$0xff] }
  0x79   : > { %555 = vmatprep.mubr.f32.mxu0 %v1809_v7  ;;  %1646 = vmatpush1.bf16.msra.mxu0 %v2140_v60 }
  0x7a   : > { %1648 = vmatprep.subr.bf16.mxu0 %v2150_v0 }
  0x7c   : > { %556 = vmatmul.mubr.f32.gmra.mrb[6].mxu0 %v1991_v63  ;;  %v1559_v63 = vld [vmem:[%s2598_s2 + $0x1b8] sm:$0xff] }
  0x7d   : > { %561 = vmatprep.mubr.f32.mxu0 %v1809_v7  ;;  %1650 = vmatpush1.bf16.msra.mxu0 %v1649_v5 }
  0x7e   : > { %1652 = vmatprep.subr.bf16.mxu0 %v1651_v10 }
  0x80   : > { %562 = vmatmul.mubr.f32.gmra.mrb[8].mxu0 %v2008_v6  ;;  %v1655_v6 = vpack.c.bf16 %v1559_v63, %v1557_v56 }
  0x81   : > { %567 = vmatprep.mubr.f32.mxu0 %v1809_v7  ;;  %1654 = vmatpush1.bf16.msra.mxu0 %v1653_v12  ;;  %v828_v12 = vld [vmem:[%s2598_s2 + $0x38] sm:$0xff] }
  0x82   : > { %1656 = vmatprep.subr.bf16.mxu0 %v1655_v6  ;;  %1704 = vmatprep.subr.bf16.mxu1 %v1655_v6 }
  0x84   : > { %568 = vmatmul.mubr.f32.gmra.mrb[10].mxu0 %v2025_v14  ;;  %v1556_v14 = vld [vmem:[%s2598_s2 + $0x1a0] sm:$0xff] }
  0x85   : > { %573 = vmatprep.mubr.f32.mxu0 %v1809_v7 }
  0x88   : > { %574 = vmatmul.mubr.f32.gmra.mrb[12].mxu0 %v2034_v19  ;;  %v1558_v19 = vld [vmem:[%s2598_s2 + $0x1b0] sm:$0xff] }
  0x89   : > { %579 = vmatprep.mubr.f32.mxu0 %v1809_v7  ;;  %v1657_v26 = vpack.c.bf16 %v1558_v19, %v1556_v14 }
  0x8b   : > { %1658 = vmatpush1.bf16.msra.mxu0 %v1657_v26  ;;  %1712 = vmatpush1.bf16.msra.mxu1 %v1657_v26 }
  0x8c   : > { %580 = vmatmul.mubr.f32.gmra.mrb[14].mxu0 %v2091_v39  ;;  %1660 = vmatprep.subr.bf16.mxu0 %v1659_v29  ;;  %v822_v39 = vld [vmem:[%s2598_s2 + $0x8] sm:$0xff] }
  0x8d   : > { %585 = vmatprep.mubr.f32.mxu0 %v1809_v7  ;;  %1705 = vmatprep.subr.bf16.mxu1 %v1659_v29  ;;  %v1667_v41 = vpack.c.bf16 %v824_v40, %v822_v39  ;;  %v831_v29 = vld [vmem:[%s2598_s2 + $0x50] sm:$0xff]  ;;  %v833_v40 = vld [vmem:[%s2598_s2 + $0x60] sm:$0xff] }
  0x8f   : > { %1662 = vmatpush1.bf16.msra.mxu0 %v1661_v32  ;;  %1713 = vmatpush1.bf16.msra.mxu1 %v1661_v32 }
  0x90   : > { %586 = vmatmul.mubr.f32.gmra.mrb[16].mxu0 %v2126_v52  ;;  %1664 = vmatprep.subr.bf16.mxu0 %v1663_v35 }
  0x91   : > { %591 = vmatprep.mubr.f32.mxu0 %v1809_v7  ;;  %1706 = vmatprep.subr.bf16.mxu1 %v1663_v35  ;;  %v836_v35 = vld [vmem:[%s2598_s2 + $0x78] sm:$0xff] }
  0x92   : > { %v1679_v39 = vpack.c.bf16 %v836_v35, %v834_v34  ;;  %v849_v34 = vld [vmem:[%s2598_s2 + $0xe0] sm:$0xff]  ;;  %v851_v35 = vld [vmem:[%s2598_s2 + $0xf0] sm:$0xff] }
  0x93   : > { %1666 = vmatpush1.bf16.msra.mxu0 %v1665_v38  ;;  %1714 = vmatpush1.bf16.msra.mxu1 %v1665_v38  ;;  %v1677_v38 = vpack.c.bf16 %v831_v29, %v829_v28  ;;  %v852_v28 = vld [vmem:[%s2598_s2 + $0xf8] sm:$0xff] }
  0x94   : > { %592 = vmatmul.mubr.f32.gmra.mrb[18].mxu0 %v2155_v1  ;;  %1668 = vmatprep.subr.bf16.mxu1 %v1667_v41  ;;  %v835_v41 = vld [vmem:[%s2598_s2 + $0x70] sm:$0xff] }
  0x95   : > { %597 = vmatprep.mubr.f32.mxu0 %v1809_v7 }
  0x98   : > { %598 = vmatmul.mubr.f32.gmra.mrb[20].mxu0 %v2173_v11  ;;  %v826_v11 = vld [vmem:[%s2598_s2 + $0x28] sm:$0xff] }
  0x99   : > { %603 = vmatprep.mubr.f32.mxu0 %v1809_v7 }
  0x9c   : > { %604 = vmatmul.mubr.f32.gmra.mrb[22].mxu0 %v1495_v13 }
  0x9d   : > { %609 = vmatprep.mubr.f32.mxu0 %v1809_v7 }
  0xa0   : > { %610 = vmatmul.mubr.f32.gmra.mrb[24].mxu0 %v1496_v15 }
  0xa1   : > { %615 = vmatprep.mubr.f32.mxu0 %v1809_v7 }
  0xa4   : > { %616 = vmatmul.mubr.f32.gmra.mrb[26].mxu0 %v1497_v16  ;;  %v1669_v16 = vpack.c.bf16 %v823_v4, %v821_v3 }
  0xa5   : > { %621 = vmatprep.mubr.f32.mxu0 %v1809_v7 }
  0xa8   : > { %622 = vmatmul.mubr.f32.gmra.mrb[28].mxu0 %v1498_v17  ;;  %v1671_v17 = vpack.c.bf16 %v828_v12, %v826_v11 }
  0xa9   : > { %627 = vmatprep.mubr.f32.mxu0 %v1809_v7 }
  0xac   : > { %628 = vmatmul.mubr.f32.gmra.mrb[30].mxu0 %v1499_v18  ;;  %v825_v18 = vld [vmem:[%s2598_s2 + $0x20] sm:$0xff] }
  0xad   : > { %633 = vmatprep.mubr.f32.mxu0 %v1809_v7 }
  0xb0   : > { %634 = vmatmul.mubr.f32.gmra.mrb[32].mxu0 %v1500_v20  ;;  %v827_v20 = vld [vmem:[%s2598_s2 + $0x30] sm:$0xff] }
  0xb1   : > { %639 = vmatprep.mubr.f32.mxu0 %v1809_v7  ;;  %v1673_v14 = vpack.c.bf16 %v827_v20, %v825_v18 }
  0xb4   : > { %640 = vmatmul.mubr.f32.gmra.mrb[34].mxu0 %v1501_v21 }
  0xb5   : > { %950 = vmatprep.mubr.f32.mxu0 %v1809_v7 }
 0x143   : > { %v539_v43 = vpop.f32.mrb[0].mxu0 }
 0x144   : > { %v541_v45 = vpop.f32.mrb[1].mxu0  ;;  %v646_v47 = vrot.slane %v539_v43, 7 }
 0x147   : > { %v545_v46 = vpop.f32.mrb[2].mxu0 }
 0x148   : > { %v655_v48 = vrot.slane %v545_v46, 7  ;;  %v547_v49 = vpop.f32.mrb[3].mxu0  ;;  %v838_v46 = vld [vmem:[%s2598_s2 + $0x88] sm:$0xff] }
 0x14a   : > { %v676_v50 = vsel %vm666_vm0, %v655_v48, %v646_v47  ;;  %v667_v51 = vsel %vm666_vm0, %v646_v47, %v655_v48  ;;  %v840_v47 = vld [vmem:[%s2598_s2 + $0x98] sm:$0xff] }
 0x14b   : > { %v685_v52 = vadd.f32 %v676_v50, %v541_v45  ;;  %v686_v53 = vadd.f32 %v667_v51, %v547_v49  ;;  %v551_v54 = vpop.f32.mrb[4].mxu0  ;;  %v1681_v51 = vpack.c.bf16 %v835_v41, %v833_v40 }
 0x14c   : > { %v553_v55 = vpop.f32.mrb[5].mxu0  ;;  %v647_v61 = vrot.slane %v551_v54, 7  ;;  %v1683_v54 = vpack.c.bf16 %v840_v47, %v838_v46 }
 0x14d   : > { %vm703_vm1 = vcmp.gt.f32.partialorder %v685_v52, 0.0  ;;  %v721_v57 = vmul.f32 0.82, %v685_v52  ;;  %v722_v58 = vmul.f32 0.82, %v686_v53  ;;  %vm704_vm2 = vcmp.gt.f32.partialorder %v686_v53, 0.0 }
 0x14f   : > { %v557_v59 = vpop.f32.mrb[6].mxu0  ;;  %v2280_v60 = vsel %vm703_vm1, %v685_v52, %v721_v57  ;;  %v2294_v10 = vsel %vm704_vm2, %v686_v53, %v722_v58  ;;  %v839_v57 = vld [vmem:[%s2598_s2 + $0x90] sm:$0xff] }
 0x150   : > { %v656_v62 = vrot.slane %v557_v59, 7  ;;  %v559_v0 = vpop.f32.mrb[7].mxu0  ;;  %951 = vmatmul.mubr.f32.vlgmr.msra.gmra.mrb[36].mxu0 %v2280_v60 }
 0x151   : > { %956 = vmatprep.mubr.f32.mxu0 %v1809_v7 }
 0x152   : > { %v677_v1 = vsel %vm666_vm0, %v656_v62, %v647_v61  ;;  %v668_v2 = vsel %vm666_vm0, %v647_v61, %v656_v62 }
 0x153   : > { %v687_v5 = vadd.f32 %v677_v1, %v553_v55  ;;  %v688_v8 = vadd.f32 %v668_v2, %v559_v0  ;;  %v563_v9 = vpop.f32.mrb[8].mxu0  ;;  %v837_v55 = vld [vmem:[%s2598_s2 + $0x80] sm:$0xff]  ;;  %v842_v0 = vld [vmem:[%s2598_s2 + $0xa8] sm:$0xff]  ;;  %v844_v1 = vld [vmem:[%s2598_s2 + $0xb8] sm:$0xff] }
 0x154   : > { %v565_v13 = vpop.f32.mrb[9].mxu0  ;;  %957 = vmatmul.mubr.f32.gmra.mrb[38].mxu0 %v2294_v10  ;;  %v648_v56 = vrot.slane %v563_v9, 7  ;;  %v1685_v4 = vpack.c.bf16 %v839_v57, %v837_v55  ;;  %v843_v9 = vld [vmem:[%s2598_s2 + $0xb0] sm:$0xff] }
 0x155   : > { %vm705_vm3 = vcmp.gt.f32.partialorder %v687_v5, 0.0  ;;  %v723_v15 = vmul.f32 0.82, %v687_v5  ;;  %v724_v21 = vmul.f32 0.82, %v688_v8  ;;  %vm706_vm4 = vcmp.gt.f32.partialorder %v688_v8, 0.0 }
 0x157   : > { %v569_v22 = vpop.f32.mrb[10].mxu0  ;;  %v2309_v23 = vsel %vm705_vm3, %v687_v5, %v723_v15  ;;  %v2329_v33 = vsel %vm706_vm4, %v688_v8, %v724_v21  ;;  %v1687_v5 = vpack.c.bf16 %v844_v1, %v842_v0  ;;  %v841_v8 = vld [vmem:[%s2598_s2 + $0xa0] sm:$0xff]  ;;  %v846_v15 = vld [vmem:[%s2598_s2 + $0xc8] sm:$0xff] }
 0x158   : > { %v657_v63 = vrot.slane %v569_v22, 7  ;;  %v571_v6 = vpop.f32.mrb[11].mxu0  ;;  %963 = vmatmul.mubr.f32.vlgmr.msra.gmra.mrb[0].mxu1 %v2309_v23  ;;  %v1689_v21 = vpack.c.bf16 %v843_v9, %v841_v8 }
 0x159   : > { %1670 = vmatpush1.bf16.msra.mxu1 %v1669_v16  ;;  %968 = vmatprep.mubr.f32.mxu1 %v1809_v7  ;;  %v848_v16 = vld [vmem:[%s2598_s2 + $0xd8] sm:$0xff] }
 0x15a   : > { %v678_v19 = vsel %vm666_vm0, %v657_v63, %v648_v56  ;;  %v669_v26 = vsel %vm666_vm0, %v648_v56, %v657_v63  ;;  %1672 = vmatprep.subr.bf16.mxu1 %v1671_v17  ;;  %v1691_v25 = vpack.c.bf16 %v848_v16, %v846_v15  ;;  %v845_v56 = vld [vmem:[%s2598_s2 + $0xc0] sm:$0xff]  ;;  %v847_v63 = vld [vmem:[%s2598_s2 + $0xd0] sm:$0xff] }
 0x15b   : > { %v689_v30 = vadd.f32 %v678_v19, %v565_v13  ;;  %v690_v31 = vadd.f32 %v669_v26, %v571_v6  ;;  %v575_v32 = vpop.f32.mrb[12].mxu0 }
 0x15c   : > { %v577_v36 = vpop.f32.mrb[13].mxu0  ;;  %969 = vmatmul.mubr.f32.gmra.mrb[2].mxu1 %v2329_v33  ;;  %v649_v48 = vrot.slane %v575_v32, 7 }
 0x15d   : > { %974 = vmatprep.mubr.f32.mxu1 %v1809_v7  ;;  %vm707_vm5 = vcmp.gt.f32.partialorder %v689_v30, 0.0  ;;  %v725_v37 = vmul.f32 0.82, %v689_v30  ;;  %1674 = vmatpush1.bf16.msra.mxu1 %v1673_v14  ;;  %v726_v42 = vmul.f32 0.82, %v690_v31  ;;  %vm708_vm6 = vcmp.gt.f32.partialorder %v690_v31, 0.0 }
 0x15e   : > { %1676 = vmatprep.subr.bf16.mxu1 %v1675_v27  ;;  %v850_v27 = vld [vmem:[%s2598_s2 + $0xe8] sm:$0xff] }
 0x15f   : > { %v581_v43 = vpop.f32.mrb[14].mxu0  ;;  %v2345_v45 = vsel %vm707_vm5, %v689_v30, %v725_v37  ;;  %v2365_v62 = vsel %vm708_vm6, %v690_v31, %v726_v42  ;;  %v1693_v31 = vpack.c.bf16 %v847_v63, %v845_v56  ;;  %v1695_v32 = vpack.c.bf16 %v852_v28, %v850_v27 }
 0x160   : > { %v658_v49 = vrot.slane %v581_v43, 7  ;;  %v583_v50 = vpop.f32.mrb[15].mxu0  ;;  %975 = vmatmul.mubr.f32.gmra.mrb[4].mxu1 %v2345_v45  ;;  %v1697_v42 = vpack.c.bf16 %v851_v35, %v849_v34 }
 0x161   : > { %980 = vmatprep.mubr.f32.mxu1 %v1809_v7  ;;  %1678 = vmatpush1.bf16.msra.mxu1 %v1677_v38 }
 0x162   : > { %v679_v52 = vsel %vm666_vm0, %v658_v49, %v649_v48  ;;  %v670_v53 = vsel %vm666_vm0, %v649_v48, %v658_v49  ;;  %1680 = vmatprep.subr.bf16.mxu1 %v1679_v39 }
 0x163   : > { %v691_v58 = vadd.f32 %v679_v52, %v577_v36  ;;  %v692_v59 = vadd.f32 %v670_v53, %v583_v50  ;;  %v587_v61 = vpop.f32.mrb[16].mxu0 }
 0x164   : > { %v589_v2 = vpop.f32.mrb[17].mxu0  ;;  %981 = vmatmul.mubr.f32.gmra.mrb[6].mxu1 %v2365_v62  ;;  %v650_v17 = vrot.slane %v587_v61, 7 }
 0x165   : > { %986 = vmatprep.mubr.f32.mxu1 %v1809_v7  ;;  %vm709_vm7 = vcmp.gt.f32.partialorder %v691_v58, 0.0  ;;  %v727_v3 = vmul.f32 0.82, %v691_v58  ;;  %1682 = vmatpush1.bf16.msra.mxu1 %v1681_v51  ;;  %v728_v11 = vmul.f32 0.82, %v692_v59  ;;  %vm710_vm8 = vcmp.gt.f32.partialorder %v692_v59, 0.0 }
 0x166   : > { %1684 = vmatprep.subr.bf16.mxu1 %v1683_v54 }
 0x167   : > { %v593_v12 = vpop.f32.mrb[18].mxu0  ;;  %v2381_v13 = vsel %vm709_vm7, %v691_v58, %v727_v3  ;;  %v2401_v26 = vsel %vm710_vm8, %v692_v59, %v728_v11 }
 0x168   : > { %v659_v18 = vrot.slane %v593_v12, 7  ;;  %v595_v20 = vpop.f32.mrb[19].mxu0  ;;  %987 = vmatmul.mubr.f32.gmra.mrb[8].mxu1 %v2381_v13 }
 0x169   : > { %992 = vmatprep.mubr.f32.mxu1 %v1809_v7  ;;  %1686 = vmatpush1.bf16.msra.mxu1 %v1685_v4 }
 0x16a   : > { %v680_v22 = vsel %vm666_vm0, %v659_v18, %v650_v17  ;;  %v671_v24 = vsel %vm666_vm0, %v650_v17, %v659_v18  ;;  %1688 = vmatprep.subr.bf16.mxu1 %v1687_v5 }
 0x16b   : > { %v693_v6 = vadd.f32 %v680_v22, %v589_v2  ;;  %v694_v14 = vadd.f32 %v671_v24, %v595_v20  ;;  %v599_v19 = vpop.f32.mrb[20].mxu0 }
 0x16c   : > { %v601_v29 = vpop.f32.mrb[21].mxu0  ;;  %993 = vmatmul.mubr.f32.gmra.mrb[10].mxu1 %v2401_v26  ;;  %v651_v39 = vrot.slane %v599_v19, 7 }
 0x16d   : > { %998 = vmatprep.mubr.f32.mxu1 %v1809_v7  ;;  %vm711_vm9 = vcmp.gt.f32.partialorder %v693_v6, 0.0  ;;  %v729_v30 = vmul.f32 0.82, %v693_v6  ;;  %1690 = vmatpush1.bf16.msra.mxu1 %v1689_v21  ;;  %v730_v36 = vmul.f32 0.82, %v694_v14  ;;  %vm712_vm10 = vcmp.gt.f32.partialorder %v694_v14, 0.0 }
 0x16e   : > { %1692 = vmatprep.subr.bf16.mxu1 %v1691_v25 }
 0x16f   : > { %v605_v37 = vpop.f32.mrb[22].mxu0  ;;  %v2417_v38 = vsel %vm711_vm9, %v693_v6, %v729_v30  ;;  %v2425_v50 = vsel %vm712_vm10, %v694_v14, %v730_v36 }
 0x170   : > { %v660_v40 = vrot.slane %v605_v37, 7  ;;  %v607_v41 = vpop.f32.mrb[23].mxu0  ;;  %999 = vmatmul.mubr.f32.gmra.mrb[12].mxu1 %v2417_v38 }
 0x171   : > { %1004 = vmatprep.mubr.f32.mxu1 %v1809_v7  ;;  %1694 = vmatpush1.bf16.msra.mxu1 %v1693_v31 }
 0x172   : > { %v681_v43 = vsel %vm666_vm0, %v660_v40, %v651_v39  ;;  %v672_v46 = vsel %vm666_vm0, %v651_v39, %v660_v40  ;;  %1696 = vmatprep.subr.bf16.mxu1 %v1695_v32 }
 0x173   : > { %v695_v47 = vadd.f32 %v681_v43, %v601_v29  ;;  %v696_v48 = vadd.f32 %v672_v46, %v607_v41  ;;  %v611_v49 = vpop.f32.mrb[24].mxu0 }
 0x174   : > { %v613_v51 = vpop.f32.mrb[25].mxu0  ;;  %1005 = vmatmul.mubr.f32.gmra.mrb[14].mxu1 %v2425_v50  ;;  %v652_v57 = vrot.slane %v611_v49, 7 }
 0x175   : > { %1010 = vmatprep.mubr.f32.mxu1 %v1809_v7  ;;  %vm713_vm11 = vcmp.gt.f32.partialorder %v695_v47, 0.0  ;;  %v731_v52 = vmul.f32 0.82, %v695_v47  ;;  %1698 = vmatpush1.bf16.msra.mxu1 %v1697_v42  ;;  %v732_v53 = vmul.f32 0.82, %v696_v48  ;;  %vm714_vm12 = vcmp.gt.f32.partialorder %v696_v48, 0.0 }
 0x177   : > { %v617_v54 = vpop.f32.mrb[26].mxu0  ;;  %v2429_v55 = vsel %vm713_vm11, %v695_v47, %v731_v52  ;;  %v2437_v4 = vsel %vm714_vm12, %v696_v48, %v732_v53 }
 0x178   : > { %v661_v58 = vrot.slane %v617_v54, 7  ;;  %v619_v59 = vpop.f32.mrb[27].mxu0  ;;  %1011 = vmatmul.mubr.f32.gmra.mrb[16].mxu1 %v2429_v55 }
 0x179   : > { %1016 = vmatprep.mubr.f32.mxu1 %v1809_v7 }
 0x17a   : > { %v682_v61 = vsel %vm666_vm0, %v661_v58, %v652_v57  ;;  %v673_v0 = vsel %vm666_vm0, %v652_v57, %v661_v58 }
 0x17b   : > { %v697_v1 = vadd.f32 %v682_v61, %v613_v51  ;;  %v698_v2 = vadd.f32 %v673_v0, %v619_v59  ;;  %v623_v3 = vpop.f32.mrb[28].mxu0  ;;  %v2508_v51 = vld [vmem:[%s2599_s3] ss:$0 sm:$0xff] }
 0x17c   : > { %v625_v5 = vpop.f32.mrb[29].mxu0  ;;  %1017 = vmatmul.mubr.f32.gmra.mrb[18].mxu1 %v2437_v4  ;;  %v653_v15 = vrot.slane %v623_v3, 7 }
 0x17d   : > { %1022 = vmatprep.mubr.f32.mxu1 %v1809_v7  ;;  %vm715_vm13 = vcmp.gt.f32.partialorder %v697_v1, 0.0  ;;  %v733_v8 = vmul.f32 0.82, %v697_v1  ;;  %v734_v9 = vmul.f32 0.82, %v698_v2  ;;  %vm716_vm14 = vcmp.gt.f32.partialorder %v698_v2, 0.0 }
 0x17f   : > { %v629_v11 = vpop.f32.mrb[30].mxu0  ;;  %v2441_v12 = vsel %vm715_vm13, %v697_v1, %v733_v8  ;;  %v2449_v25 = vsel %vm716_vm14, %v698_v2, %v734_v9 }
 0x180   : > { %v662_v16 = vrot.slane %v629_v11, 7  ;;  %v631_v17 = vpop.f32.mrb[31].mxu0  ;;  %1023 = vmatmul.mubr.f32.gmra.mrb[20].mxu1 %v2441_v12 }
 0x181   : > { %1028 = vmatprep.mubr.f32.mxu1 %v1809_v7 }
 0x182   : > { %v683_v18 = vsel %vm666_vm0, %v662_v16, %v653_v15  ;;  %v674_v20 = vsel %vm666_vm0, %v653_v15, %v662_v16 }
 0x183   : > { %v699_v21 = vadd.f32 %v683_v18, %v625_v5  ;;  %v700_v22 = vadd.f32 %v674_v20, %v631_v17  ;;  %v635_v24 = vpop.f32.mrb[32].mxu0 }
 0x184   : > { %v637_v56 = vpop.f32.mrb[33].mxu0  ;;  %1029 = vmatmul.mubr.f32.gmra.mrb[22].mxu1 %v2449_v25  ;;  %v654_v27 = vrot.slane %v635_v24, 7 }
 0x185   : > { %1034 = vmatprep.mubr.f32.mxu1 %v1809_v7  ;;  %vm717_vm15 = vcmp.gt.f32.partialorder %v699_v21, 0.0  ;;  %v735_v63 = vmul.f32 0.82, %v699_v21  ;;  %v736_v6 = vmul.f32 0.82, %v700_v22  ;;  %vm718_vm1 = vcmp.gt.f32.partialorder %v700_v22, 0.0 }
 0x187   : > { %v641_v14 = vpop.f32.mrb[34].mxu0  ;;  %v753_v19 = vsel %vm717_vm15, %v699_v21, %v735_v63  ;;  %v754_v35 = vsel %vm718_vm1, %v700_v22, %v736_v6 }
 0x188   : > { %v663_v28 = vrot.slane %v641_v14, 7  ;;  %v643_v29 = vpop.f32.mrb[35].mxu0  ;;  %1035 = vmatmul.mubr.f32.gmra.mrb[24].mxu1 %v753_v19 }
 0x189   : > { %1040 = vmatprep.mubr.f32.mxu1 %v1809_v7 }
 0x18a   : > { %v684_v30 = vsel %vm666_vm0, %v663_v28, %v654_v27  ;;  %v675_v31 = vsel %vm666_vm0, %v654_v27, %v663_v28  ;;  %vm1276_vm0 = vcmp.lt.s32.totalorder %v2273_v44, 7 }
 0x18b   : > { %v701_v32 = vadd.f32 %v684_v30, %v637_v56  ;;  %v702_v34 = vadd.f32 %v675_v31, %v643_v29 }
 0x18c   : > { %1041 = vmatmul.mubr.f32.gmra.mrb[26].mxu1 %v754_v35 }
 0x18d   : > { %1046 = vmatprep.mubr.f32.mxu1 %v1809_v7  ;;  %vm719_vm2 = vcmp.gt.f32.partialorder %v701_v32, 0.0  ;;  %v737_v36 = vmul.f32 0.82, %v701_v32  ;;  %v738_v37 = vmul.f32 0.82, %v702_v34  ;;  %vm720_vm3 = vcmp.gt.f32.partialorder %v702_v34, 0.0 }
 0x18f   : > { %v755_v39 = vsel %vm719_vm2, %v701_v32, %v737_v36  ;;  %v756_v40 = vsel %vm720_vm3, %v702_v34, %v738_v37 }
 0x190   : > { %1047 = vmatmul.mubr.f32.gmra.mrb[28].mxu1 %v755_v39 }
 0x191   : > { %1052 = vmatprep.mubr.f32.mxu1 %v1809_v7 }
 0x194   : > { %1053 = vmatmul.mubr.f32.gmra.mrb[30].mxu1 %v756_v40 }
 0x195   : > { %1058 = vmatprep.mubr.f32.mxu1 %v1809_v7 }
 0x198   : > { %1059 = vmatmul.mubr.f32.gmra.mrb[32].mxu1 %v1809_v7 }
 0x199   : > { %1064 = vmatprep.mubr.f32.mxu1 %v1809_v7 }
 0x19c   : > { %1065 = vmatmul.mubr.f32.gmra.mrb[34].mxu1 %v1809_v7 }
 0x19d   : > { %1135 = vmatprep.mubr.f32.mxu1 %v1809_v7 }
 0x1a0   : > { %1136 = vmatmul.mubr.f32.vlgmr.msra.gmra.mrb[36].mxu1 %v1809_v7 }
 0x1a1   : > { %1141 = vmatprep.mubr.f32.mxu1 %v1809_v7 }
 0x1a4   : > { %1142 = vmatmul.mubr.f32.gmra.mrb[38].mxu1 %v1809_v7 }
 0x1a5   : > { %1147 = vmatprep.mubr.f32.mxu1 %v1809_v7 }
 0x1a8   : > { %1148 = vmatmul.mubr.f32.gmra.mrb[0].mxu1 %v2280_v60 }
 0x1a9   : > { %1153 = vmatprep.mubr.f32.mxu1 %v1809_v7 }
 0x1ac   : > { %1154 = vmatmul.mubr.f32.gmra.mrb[2].mxu1 %v2294_v10 }
 0x1ad   : > { %1159 = vmatprep.mubr.f32.mxu1 %v1809_v7 }
 0x1b0   : > { %1160 = vmatmul.mubr.f32.gmra.mrb[4].mxu1 %v2309_v23 }
 0x1b1   : > { %1165 = vmatprep.mubr.f32.mxu1 %v1809_v7 }
 0x1b4   : > { %1166 = vmatmul.mubr.f32.gmra.mrb[6].mxu1 %v2329_v33 }
 0x1b5   : > { %1171 = vmatprep.mubr.f32.mxu1 %v1809_v7 }
 0x1b8   : > { %1172 = vmatmul.mubr.f32.gmra.mrb[8].mxu1 %v2345_v45 }
 0x1b9   : > { %1177 = vmatprep.mubr.f32.mxu1 %v1809_v7 }
 0x1bc   : > { %1178 = vmatmul.mubr.f32.gmra.mrb[10].mxu1 %v2365_v62 }
 0x1bd   : > { %1183 = vmatprep.mubr.f32.mxu1 %v1809_v7 }
 0x1c0   : > { %1184 = vmatmul.mubr.f32.gmra.mrb[12].mxu1 %v2381_v13 }
 0x1c1   : > { %1189 = vmatprep.mubr.f32.mxu1 %v1809_v7 }
 0x1c4   : > { %1190 = vmatmul.mubr.f32.gmra.mrb[14].mxu1 %v2401_v26 }
 0x1c5   : > { %1195 = vmatprep.mubr.f32.mxu1 %v1809_v7 }
 0x1c8   : > { %1196 = vmatmul.mubr.f32.gmra.mrb[16].mxu1 %v2417_v38 }
 0x1c9   : > { %1201 = vmatprep.mubr.f32.mxu1 %v1809_v7 }
 0x1cc   : > { %1202 = vmatmul.mubr.f32.gmra.mrb[18].mxu1 %v2425_v50 }
 0x1cd   : > { %1207 = vmatprep.mubr.f32.mxu1 %v1809_v7 }
 0x1d0   : > { %1208 = vmatmul.mubr.f32.gmra.mrb[20].mxu1 %v2429_v55 }
 0x1d1   : > { %1213 = vmatprep.mubr.f32.mxu1 %v1809_v7 }
 0x1d4   : > { %1214 = vmatmul.mubr.f32.gmra.mrb[22].mxu1 %v2437_v4 }
 0x1d5   : > { %1219 = vmatprep.mubr.f32.mxu1 %v1809_v7 }
 0x1d8   : > { %1220 = vmatmul.mubr.f32.gmra.mrb[24].mxu1 %v2441_v12 }
 0x1d9   : > { %1225 = vmatprep.mubr.f32.mxu1 %v1809_v7 }
 0x1dc   : > { %1226 = vmatmul.mubr.f32.gmra.mrb[26].mxu1 %v2449_v25 }
 0x1dd   : > { %1231 = vmatprep.mubr.f32.mxu1 %v1809_v7 }
 0x1e0   : > { %1232 = vmatmul.mubr.f32.gmra.mrb[28].mxu1 %v753_v19 }
 0x1e1   : > { %1237 = vmatprep.mubr.f32.mxu1 %v1809_v7 }
 0x1e4   : > { %1238 = vmatmul.mubr.f32.gmra.mrb[30].mxu1 %v754_v35 }
 0x1e5   : > { %1243 = vmatprep.mubr.f32.mxu1 %v1809_v7 }
 0x1e8   : > { %1244 = vmatmul.mubr.f32.gmra.mrb[32].mxu1 %v755_v39 }
 0x1e9   : > { %1249 = vmatprep.mubr.f32.mxu1 %v1809_v7 }
 0x1ec   : > { %1250 = vmatmul.mubr.f32.gmra.mrb[34].mxu1 %v756_v40 }
 0x223   : > { %v952_v60 = vpop.f32.mrb[36].mxu0 }
 0x224   : > { %v954_v10 = vpop.f32.mrb[37].mxu0 }
 0x227   : > { %v958_v23 = vpop.f32.mrb[38].mxu0 }
 0x228   : > { %v960_v33 = vpop.f32.mrb[39].mxu0 }
 0x273   : > { %v1137_v45 = vpop.f32.mrb[36].mxu1 }
 0x274   : > { %v1138_v62 = vadd.f32 %v1137_v45, %v952_v60  ;;  %v1139_v13 = vpop.f32.mrb[37].mxu1 }
 0x275   : > { %v1140_v26 = vadd.f32 %v1139_v13, %v954_v10 }
 0x277   : > { %v1143_v38 = vpop.f32.mrb[38].mxu1  ;;  %v1256_v46 = vrot.slane %v1140_v26, 1 }
 0x278   : > { %v1144_v41 = vadd.f32 %v1143_v38, %v958_v23  ;;  %v1145_v42 = vpop.f32.mrb[39].mxu1 }
 0x279   : > { %v1146_v43 = vadd.f32 %v1145_v42, %v960_v33 }
 0x27b   : > { %v1266_v47 = vrot.slane %v1146_v43, 1  ;;  %v1149_v48 = vpop.f32.mrb[0].mxu1 }
 0x27c   : > { %v1151_v7 = vpop.f32.mrb[1].mxu1 }
 0x27d   : > { %v1277_v49 = vsel %vm1276_vm0, %v1256_v46, %v1266_v47  ;;  %v1287_v50 = vsel %vm1276_vm0, %v1266_v47, %v1256_v46  ;;  %v1257_v59 = vrot.slane %v1151_v7, 1 }
 0x27e   : > { %v1297_v52 = vadd.f32 %v1277_v49, %v1138_v62  ;;  %v1298_v53 = vadd.f32 %v1287_v50, %v1144_v41 }
 0x27f   : > { %v1155_v54 = vpop.f32.mrb[2].mxu1 }
 0x280   : > { %v1324_v55 = vadd.f32 %v2508_v51, %v1297_v52  ;;  %v1325_v57 = vadd.f32 %v2508_v51, %v1298_v53  ;;  %v1157_v58 = vpop.f32.mrb[3].mxu1 }
 0x281   : > { %v1267_v61 = vrot.slane %v1157_v58, 1 }
 0x282   : > { %vm1344_vm4 = vcmp.gt.f32.partialorder %v1324_v55, 0.0  ;;  %vm1345_vm5 = vcmp.gt.f32.partialorder %v1325_v57, 0.0  ;;  %v1364_v0 = vmul.f32 0.82, %v1324_v55  ;;  %v1365_v1 = vmul.f32 0.82, %v1325_v57 }
 0x283   : > { %v1278_v2 = vsel %vm1276_vm0, %v1257_v59, %v1267_v61  ;;  %v1288_v3 = vsel %vm1276_vm0, %v1267_v61, %v1257_v59  ;;  %v1161_v4 = vpop.f32.mrb[4].mxu1 }
 0x284   : > { %v1384_v5 = vsel %vm1344_vm4, %v1324_v55, %v1364_v0  ;;  %v1385_v8 = vsel %vm1345_vm5, %v1325_v57, %v1365_v1  ;;  %v1299_v9 = vadd.f32 %v1278_v2, %v1149_v48  ;;  %v1300_v11 = vadd.f32 %v1288_v3, %v1155_v54  ;;  %v1163_v12 = vpop.f32.mrb[5].mxu1 }
 0x285   : > { %1404 = vst [vmem:[%s2517_s14] sm:$0xff] %v1384_v5  ;;  %1405 = vst [vmem:[%s2517_s14 + $0x8] sm:$0xff] %v1385_v8  ;;  %v1258_v25 = vrot.slane %v1163_v12, 1 }
 0x286   : > { %v1326_v15 = vadd.f32 %v2508_v51, %v1299_v9  ;;  %v1327_v16 = vadd.f32 %v2508_v51, %v1300_v11 }
 0x287   : > { %v1167_v17 = vpop.f32.mrb[6].mxu1 }
 0x288   : > { %vm1346_vm6 = vcmp.gt.f32.partialorder %v1326_v15, 0.0  ;;  %vm1347_vm7 = vcmp.gt.f32.partialorder %v1327_v16, 0.0  ;;  %v1366_v18 = vmul.f32 0.82, %v1326_v15  ;;  %v1367_v20 = vmul.f32 0.82, %v1327_v16 }
 0x289   : > { %v1169_v21 = vpop.f32.mrb[7].mxu1 }
 0x28a   : > { %v1386_v22 = vsel %vm1346_vm6, %v1326_v15, %v1366_v18  ;;  %v1387_v24 = vsel %vm1347_vm7, %v1327_v16, %v1367_v20  ;;  %v1268_v56 = vrot.slane %v1169_v21, 1 }
 0x28b   : > { %1406 = vst [vmem:[%s2517_s14 + $0x10] sm:$0xff] %v1386_v22  ;;  %1407 = vst [vmem:[%s2517_s14 + $0x18] sm:$0xff] %v1387_v24  ;;  %v1173_v63 = vpop.f32.mrb[8].mxu1 }
 0x28c   : > { %v1279_v6 = vsel %vm1276_vm0, %v1258_v25, %v1268_v56  ;;  %v1289_v14 = vsel %vm1276_vm0, %v1268_v56, %v1258_v25  ;;  %v1175_v19 = vpop.f32.mrb[9].mxu1 }
 0x28d   : > { %v1301_v27 = vadd.f32 %v1279_v6, %v1161_v4  ;;  %v1302_v28 = vadd.f32 %v1289_v14, %v1167_v17  ;;  %v1259_v36 = vrot.slane %v1175_v19, 1 }
 0x28f   : > { %v1328_v29 = vadd.f32 %v2508_v51, %v1301_v27  ;;  %v1329_v30 = vadd.f32 %v2508_v51, %v1302_v28  ;;  %v1179_v31 = vpop.f32.mrb[10].mxu1 }
 0x290   : > { %v1181_v32 = vpop.f32.mrb[11].mxu1 }
 0x291   : > { %vm1348_vm8 = vcmp.gt.f32.partialorder %v1328_v29, 0.0  ;;  %vm1349_vm9 = vcmp.gt.f32.partialorder %v1329_v30, 0.0  ;;  %v1368_v34 = vmul.f32 0.82, %v1328_v29  ;;  %v1369_v35 = vmul.f32 0.82, %v1329_v30 }
 0x292   : > { %v1269_v37 = vrot.slane %v1181_v32, 1 }
 0x293   : > { %v1388_v39 = vsel %vm1348_vm8, %v1328_v29, %v1368_v34  ;;  %v1389_v40 = vsel %vm1349_vm9, %v1329_v30, %v1369_v35  ;;  %v1185_v60 = vpop.f32.mrb[12].mxu1 }
 0x294   : > { %1408 = vst [vmem:[%s2517_s14 + $0x20] sm:$0xff] %v1388_v39  ;;  %1409 = vst [vmem:[%s2517_s14 + $0x28] sm:$0xff] %v1389_v40  ;;  %v1280_v10 = vsel %vm1276_vm0, %v1259_v36, %v1269_v37  ;;  %v1290_v23 = vsel %vm1276_vm0, %v1269_v37, %v1259_v36  ;;  %v1187_v33 = vpop.f32.mrb[13].mxu1 }
 0x295   : > { %v1303_v45 = vadd.f32 %v1280_v10, %v1173_v63  ;;  %v1304_v62 = vadd.f32 %v1290_v23, %v1179_v31  ;;  %v1260_v46 = vrot.slane %v1187_v33, 1 }
 0x297   : > { %v1330_v13 = vadd.f32 %v2508_v51, %v1303_v45  ;;  %v1331_v26 = vadd.f32 %v2508_v51, %v1304_v62  ;;  %v1191_v38 = vpop.f32.mrb[14].mxu1 }
 0x298   : > { %v1193_v41 = vpop.f32.mrb[15].mxu1 }
 0x299   : > { %vm1350_vm10 = vcmp.gt.f32.partialorder %v1330_v13, 0.0  ;;  %vm1351_vm11 = vcmp.gt.f32.partialorder %v1331_v26, 0.0  ;;  %v1370_v42 = vmul.f32 0.82, %v1330_v13  ;;  %v1371_v43 = vmul.f32 0.82, %v1331_v26 }
 0x29a   : > { %v1270_v47 = vrot.slane %v1193_v41, 1 }
 0x29b   : > { %v1390_v48 = vsel %vm1350_vm10, %v1330_v13, %v1370_v42  ;;  %v1391_v7 = vsel %vm1351_vm11, %v1331_v26, %v1371_v43  ;;  %v1197_v49 = vpop.f32.mrb[16].mxu1 }
 0x29c   : > { %1410 = vst [vmem:[%s2517_s14 + $0x30] sm:$0xff] %v1390_v48  ;;  %1411 = vst [vmem:[%s2517_s14 + $0x38] sm:$0xff] %v1391_v7  ;;  %v1281_v50 = vsel %vm1276_vm0, %v1260_v46, %v1270_v47  ;;  %v1291_v52 = vsel %vm1276_vm0, %v1270_v47, %v1260_v46  ;;  %v1199_v53 = vpop.f32.mrb[17].mxu1 }
 0x29d   : > { %v1305_v54 = vadd.f32 %v1281_v50, %v1185_v60  ;;  %v1306_v55 = vadd.f32 %v1291_v52, %v1191_v38  ;;  %v1261_v2 = vrot.slane %v1199_v53, 1 }
 0x29f   : > { %v1332_v57 = vadd.f32 %v2508_v51, %v1305_v54  ;;  %v1333_v58 = vadd.f32 %v2508_v51, %v1306_v55  ;;  %v1203_v59 = vpop.f32.mrb[18].mxu1 }
 0x2a0   : > { %v1205_v61 = vpop.f32.mrb[19].mxu1 }
 0x2a1   : > { %vm1352_vm12 = vcmp.gt.f32.partialorder %v1332_v57, 0.0  ;;  %vm1353_vm13 = vcmp.gt.f32.partialorder %v1333_v58, 0.0  ;;  %v1372_v0 = vmul.f32 0.82, %v1332_v57  ;;  %v1373_v1 = vmul.f32 0.82, %v1333_v58 }
 0x2a2   : > { %v1271_v3 = vrot.slane %v1205_v61, 1 }
 0x2a3   : > { %v1392_v4 = vsel %vm1352_vm12, %v1332_v57, %v1372_v0  ;;  %v1393_v5 = vsel %vm1353_vm13, %v1333_v58, %v1373_v1  ;;  %v1209_v8 = vpop.f32.mrb[20].mxu1 }
 0x2a4   : > { %1412 = vst [vmem:[%s2517_s14 + $0x40] sm:$0xff] %v1392_v4  ;;  %1413 = vst [vmem:[%s2517_s14 + $0x48] sm:$0xff] %v1393_v5  ;;  %v1282_v9 = vsel %vm1276_vm0, %v1261_v2, %v1271_v3  ;;  %v1292_v11 = vsel %vm1276_vm0, %v1271_v3, %v1261_v2  ;;  %v1211_v12 = vpop.f32.mrb[21].mxu1 }
 0x2a5   : > { %v1307_v15 = vadd.f32 %v1282_v9, %v1197_v49  ;;  %v1308_v16 = vadd.f32 %v1292_v11, %v1203_v59  ;;  %v1262_v25 = vrot.slane %v1211_v12, 1 }
 0x2a7   : > { %v1334_v17 = vadd.f32 %v2508_v51, %v1307_v15  ;;  %v1335_v18 = vadd.f32 %v2508_v51, %v1308_v16  ;;  %v1215_v20 = vpop.f32.mrb[22].mxu1 }
 0x2a8   : > { %v1217_v21 = vpop.f32.mrb[23].mxu1 }
 0x2a9   : > { %vm1354_vm14 = vcmp.gt.f32.partialorder %v1334_v17, 0.0  ;;  %vm1355_vm15 = vcmp.gt.f32.partialorder %v1335_v18, 0.0  ;;  %v1374_v22 = vmul.f32 0.82, %v1334_v17  ;;  %v1375_v24 = vmul.f32 0.82, %v1335_v18 }
 0x2aa   : > { %v1272_v56 = vrot.slane %v1217_v21, 1 }
 0x2ab   : > { %v1394_v63 = vsel %vm1354_vm14, %v1334_v17, %v1374_v22  ;;  %v1395_v6 = vsel %vm1355_vm15, %v1335_v18, %v1375_v24  ;;  %v1221_v14 = vpop.f32.mrb[24].mxu1 }
 0x2ac   : > { %1414 = vst [vmem:[%s2517_s14 + $0x50] sm:$0xff] %v1394_v63  ;;  %1415 = vst [vmem:[%s2517_s14 + $0x58] sm:$0xff] %v1395_v6  ;;  %v1283_v19 = vsel %vm1276_vm0, %v1262_v25, %v1272_v56  ;;  %v1293_v27 = vsel %vm1276_vm0, %v1272_v56, %v1262_v25  ;;  %v1223_v28 = vpop.f32.mrb[25].mxu1 }
 0x2ad   : > { %v1309_v29 = vadd.f32 %v1283_v19, %v1209_v8  ;;  %v1310_v30 = vadd.f32 %v1293_v27, %v1215_v20  ;;  %v1263_v39 = vrot.slane %v1223_v28, 1 }
 0x2af   : > { %v1336_v31 = vadd.f32 %v2508_v51, %v1309_v29  ;;  %v1337_v32 = vadd.f32 %v2508_v51, %v1310_v30  ;;  %v1227_v34 = vpop.f32.mrb[26].mxu1 }
 0x2b0   : > { %v1229_v35 = vpop.f32.mrb[27].mxu1 }
 0x2b1   : > { %vm1356_vm1 = vcmp.gt.f32.partialorder %v1336_v31, 0.0  ;;  %vm1357_vm2 = vcmp.gt.f32.partialorder %v1337_v32, 0.0  ;;  %v1376_v36 = vmul.f32 0.82, %v1336_v31  ;;  %v1377_v37 = vmul.f32 0.82, %v1337_v32 }
 0x2b2   : > { %v1273_v40 = vrot.slane %v1229_v35, 1 }
 0x2b3   : > { %v1396_v60 = vsel %vm1356_vm1, %v1336_v31, %v1376_v36  ;;  %v1397_v10 = vsel %vm1357_vm2, %v1337_v32, %v1377_v37  ;;  %v1233_v23 = vpop.f32.mrb[28].mxu1 }
 0x2b4   : > { %1416 = vst [vmem:[%s2517_s14 + $0x60] sm:$0xff] %v1396_v60  ;;  %1417 = vst [vmem:[%s2517_s14 + $0x68] sm:$0xff] %v1397_v10  ;;  %v1284_v33 = vsel %vm1276_vm0, %v1263_v39, %v1273_v40  ;;  %v1294_v45 = vsel %vm1276_vm0, %v1273_v40, %v1263_v39  ;;  %v1235_v62 = vpop.f32.mrb[29].mxu1 }
 0x2b5   : > { %v1311_v13 = vadd.f32 %v1284_v33, %v1221_v14  ;;  %v1312_v26 = vadd.f32 %v1294_v45, %v1227_v34  ;;  %v1264_v48 = vrot.slane %v1235_v62, 1 }
 0x2b7   : > { %v1338_v38 = vadd.f32 %v2508_v51, %v1311_v13  ;;  %v1339_v41 = vadd.f32 %v2508_v51, %v1312_v26  ;;  %v1239_v42 = vpop.f32.mrb[30].mxu1 }
 0x2b8   : > { %v1241_v43 = vpop.f32.mrb[31].mxu1 }
 0x2b9   : > { %vm1358_vm3 = vcmp.gt.f32.partialorder %v1338_v38, 0.0  ;;  %vm1359_vm4 = vcmp.gt.f32.partialorder %v1339_v41, 0.0  ;;  %v1378_v46 = vmul.f32 0.82, %v1338_v38  ;;  %v1379_v47 = vmul.f32 0.82, %v1339_v41 }
 0x2ba   : > { %v1274_v7 = vrot.slane %v1241_v43, 1 }
 0x2bb   : > { %v1398_v49 = vsel %vm1358_vm3, %v1338_v38, %v1378_v46  ;;  %v1399_v50 = vsel %vm1359_vm4, %v1339_v41, %v1379_v47  ;;  %v1245_v52 = vpop.f32.mrb[32].mxu1 }
 0x2bc   : > { %1418 = vst [vmem:[%s2517_s14 + $0x70] sm:$0xff] %v1398_v49  ;;  %1419 = vst [vmem:[%s2517_s14 + $0x78] sm:$0xff] %v1399_v50  ;;  %v1285_v53 = vsel %vm1276_vm0, %v1264_v48, %v1274_v7  ;;  %v1295_v54 = vsel %vm1276_vm0, %v1274_v7, %v1264_v48  ;;  %v1247_v55 = vpop.f32.mrb[33].mxu1 }
 0x2bd   : > { %v1313_v57 = vadd.f32 %v1285_v53, %v1233_v23  ;;  %v1314_v58 = vadd.f32 %v1295_v54, %v1239_v42  ;;  %v1265_v4 = vrot.slane %v1247_v55, 1 }
 0x2bf   : > { %v1340_v59 = vadd.f32 %v2508_v51, %v1313_v57  ;;  %v1341_v61 = vadd.f32 %v2508_v51, %v1314_v58  ;;  %v1251_v0 = vpop.f32.mrb[34].mxu1 }
 0x2c0   : > { %v1253_v1 = vpop.f32.mrb[35].mxu1 }
 0x2c1   : > { %vm1360_vm5 = vcmp.gt.f32.partialorder %v1340_v59, 0.0  ;;  %vm1361_vm6 = vcmp.gt.f32.partialorder %v1341_v61, 0.0  ;;  %v1380_v2 = vmul.f32 0.82, %v1340_v59  ;;  %v1381_v3 = vmul.f32 0.82, %v1341_v61 }
 0x2c2   : > { %v1275_v5 = vrot.slane %v1253_v1, 1 }
 0x2c3   : > { %v1400_v8 = vsel %vm1360_vm5, %v1340_v59, %v1380_v2  ;;  %v1401_v9 = vsel %vm1361_vm6, %v1341_v61, %v1381_v3 }
 0x2c4   : > { %1420 = vst [vmem:[%s2517_s14 + $0x80] sm:$0xff] %v1400_v8  ;;  %1421 = vst [vmem:[%s2517_s14 + $0x88] sm:$0xff] %v1401_v9  ;;  %v1286_v11 = vsel %vm1276_vm0, %v1265_v4, %v1275_v5  ;;  %v1296_v12 = vsel %vm1276_vm0, %v1275_v5, %v1265_v4 }
 0x2c5   : > { %v1315_v15 = vadd.f32 %v1286_v11, %v1245_v52  ;;  %v1316_v16 = vadd.f32 %v1296_v12, %v1251_v0 }
 0x2c7   : > { %v1342_v17 = vadd.f32 %v2508_v51, %v1315_v15  ;;  %v1343_v18 = vadd.f32 %v2508_v51, %v1316_v16 }
 0x2c9   : > { %vm1362_vm7 = vcmp.gt.f32.partialorder %v1342_v17, 0.0  ;;  %vm1363_vm8 = vcmp.gt.f32.partialorder %v1343_v18, 0.0  ;;  %v1382_v20 = vmul.f32 0.82, %v1342_v17  ;;  %v1383_v21 = vmul.f32 0.82, %v1343_v18 }
 0x2cb   : > { %v1402_v22 = vsel %vm1362_vm7, %v1342_v17, %v1382_v20  ;;  %v1403_v24 = vsel %vm1363_vm8, %v1343_v18, %v1383_v21 }
 0x2cc   : > { %1422 = vst [vmem:[%s2517_s14 + $0x90] sm:$0xff] %v1402_v22  ;;  %1423 = vst [vmem:[%s2517_s14 + $0x98] sm:$0xff] %v1403_v24 }
 0x2cd PF: > { %s14_s15 = sadd.s32 1, %s1807_s15  }
 0x2ce   : > { %p11_p4 = scmp.ge.s32.totalorder %s14_s15, 4  }
 0x2d0   :  { %13 = sbr.rel (!%p11_p4) target bundleno = 1 (0x1), region = 71 }

</bundles_post_ra>
